<compile_context>
chip_gen: v5e
topology: v5e:2x2
jax: 0.10.0
libtpu: 0.0.40
codegen_flags: <defaults>
</compile_context>

<pallas_src>
import functools

import jax
import jax.numpy as jnp
from jax import lax
from jax.experimental import pallas as pl
from jax.experimental.pallas import tpu as pltpu


def _round_up(x, m):
    return ((x + m - 1) // m) * m


def _decoder_kernel(a_ref, b_ref, o_ref, *, mxu_bf16):
    # a_ref: (tm, D) row block of z; b_ref: (tn, D) row block of z (or all of z).
    a = a_ref[...]
    b = b_ref[...]
    if mxu_bf16:
        # v5e's MXU is bf16-native; sigmoid saturation makes the loss negligible.
        a = a.astype(jnp.bfloat16)
        b = b.astype(jnp.bfloat16)
    # Contract the last axis of BOTH operands -> (tm, tn): native transposed-RHS
    # MXU contraction (no in-kernel transpose), f32 accumulation.
    logits = lax.dot_general(
        a, b,
        dimension_numbers=(((1,), (1,)), ((), ())),
        preferred_element_type=jnp.float32,
    )
    # Fused activation (sigmoid -> EUP) on the f32 tile, single lane-dense store.
    o_ref[...] = jax.nn.sigmoid(logits).astype(o_ref.dtype)


# Keep the per-call working set under the 32 MiB scoped-VMEM default everywhere.
_VMEM_BUDGET = 28 * 1024 * 1024
_RESIDENT_Z_LIMIT = 8 * 1024 * 1024


def inner_product_decoder(z, *, dropout=0.0, training=False, tm=None, tn=None,
                          out_dtype=None, mxu_bf16=False):
    """sigmoid(z @ z.T) with matmul + activation fused in one Pallas kernel.

    Dropout with training=False (the usual inference path for this decoder) is
    the identity, so nothing is applied here.
    """
    # TODO(synk): training-mode dropout (random mask via pltpu.prng_*) not
    # implemented; the decoder is evaluated in eval mode.
    del dropout, training

    N, D = z.shape
    out_dtype = z.dtype if out_dtype is None else jnp.dtype(out_dtype)
    in_b = z.dtype.itemsize
    out_b = jnp.dtype(out_dtype).itemsize

    # Layout-padded extents (what a VMEM buffer of this logical shape costs).
    n_lane = _round_up(N, 128)
    d_lane = _round_up(D, 128)
    n_sub = _round_up(N, 8)

    kernel = functools.partial(_decoder_kernel, mxu_bf16=mxu_bf16)

    # ---------- Path A: resident z (RHS), 1-D grid over row blocks ----------
    resident_bytes = 2 * n_sub * d_lane * in_b  # full z in VMEM (x2, conservative)
    if tn is None and resident_bytes <= _RESIDENT_Z_LIMIT:
        tm_a = (256 if N <= 2048 else 512) if tm is None else tm
        # Full-extent block if it covers all rows, else an 8-aligned ragged block.
        tm_a = N if tm_a >= N else _round_up(max(tm_a, 8), 8)

        def footprint(t):
            return (resident_bytes
                    + 2 * t * d_lane * in_b        # double-buffered A row block
                    + 2 * t * n_lane * out_b       # double-buffered output rows
                    + t * n_lane * 4)              # f32 logits temporary

        while tm_a > 8 and footprint(tm_a) > _VMEM_BUDGET:
            tm_a = max(8, _round_up(tm_a // 2, 8))

        if footprint(tm_a) <= _VMEM_BUDGET:
            grid = (pl.cdiv(N, tm_a),)
            cost = pl.CostEstimate(
                flops=2 * N * N * D,
                transcendentals=N * N,
                bytes_accessed=in_b * 2 * N * D + out_b * N * N,
            )
            return pl.pallas_call(
                kernel,
                out_shape=jax.ShapeDtypeStruct((N, N), out_dtype),
                grid=grid,
                in_specs=[
                    pl.BlockSpec((tm_a, D), lambda i: (i, 0)),  # row block i of z
                    pl.BlockSpec((N, D), lambda i: (0, 0)),     # all of z, resident
                ],
                out_specs=pl.BlockSpec((tm_a, N), lambda i: (i, 0)),
                compiler_params=pltpu.CompilerParams(
                    dimension_semantics=("parallel",),
                ),
                cost_estimate=cost,
            )(z, z)

    # ---------- Path B: streamed 2-D tiles (large N*D) ----------------------
    # TODO(synk): for very large D (>~4K) a k-loop + f32 accumulator would be
    # needed to bound the (tm, D)/(tn, D) input blocks; GAE latent dims are small.
    if tm is None:
        tm = 256 if N <= 2048 else 512
    if tn is None:
        tn = 512
    tm = N if tm >= N else _round_up(max(tm, 8), 8)       # sublane-legal
    tn = N if tn >= N else _round_up(max(tn, 128), 128)   # lane-legal

    grid = (pl.cdiv(N, tm), pl.cdiv(N, tn))
    cost = pl.CostEstimate(
        flops=2 * N * N * D,
        transcendentals=N * N,
        # A fetched once per row block (re-DMA skipped across j); B re-streamed
        # once per (i, j) step; plus the N^2 output write.
        bytes_accessed=in_b * (N * D + grid[0] * N * D) + out_b * N * N,
    )
    return pl.pallas_call(
        kernel,
        out_shape=jax.ShapeDtypeStruct((N, N), out_dtype),
        grid=grid,
        in_specs=[
            pl.BlockSpec((tm, D), lambda i, j: (i, 0)),  # row block i of z
            pl.BlockSpec((tn, D), lambda i, j: (j, 0)),  # row block j of z (RHS)
        ],
        out_specs=pl.BlockSpec((tm, tn), lambda i, j: (i, j)),
        compiler_params=pltpu.CompilerParams(
            dimension_semantics=("parallel", "parallel"),
        ),
        cost_estimate=cost,
    )(z, z)


if __name__ == "__main__":
    key = jax.random.PRNGKey(0)

    # Small, deterministic example: N nodes = 256, latent dim D = 64.
    N, D = 256, 64
    z = jax.random.normal(key, (N, D), dtype=jnp.float32)
    adj = jax.block_until_ready(inner_product_decoder(z))
    ref = jax.nn.sigmoid(z @ z.T)
    assert adj.shape == (N, N)
    assert jnp.allclose(adj, ref, atol=1e-5, rtol=1e-5), "mismatch vs reference"

    # Awkward shape (non-multiple of 128 / tile size): exercises the ragged
    # cdiv grid with exact (N, N) output — no padding, no post-slice.
    N2, D2 = 300, 48
    z2 = jax.random.normal(jax.random.PRNGKey(0), (N2, D2), dtype=jnp.float32)
    adj2 = jax.block_until_ready(inner_product_decoder(z2))
    ref2 = jax.nn.sigmoid(z2 @ z2.T)
    assert adj2.shape == (N2, N2)
    assert jnp.allclose(adj2, ref2, atol=1e-5, rtol=1e-5), "mismatch vs reference (ragged)"

    print("KERNEL_OK")
</pallas_src>

<mosaic_0001>
module attributes {stable_mosaic.version = 11 : i64} {
  func.func @_decoder_kernel(%arg0: i32, %arg1: memref<256x64xf32, #tpu.memory_space<vmem>>, %arg2: memref<256x64xf32, #tpu.memory_space<vmem>>, %arg3: memref<256x256xf32, #tpu.memory_space<vmem>>) attributes {dimension_semantics = [#tpu.dimension_semantics<parallel>], iteration_bounds = array<i64: 1>, scalar_prefetch = 0 : i64, scratch_operands = 0 : i64, tpu.core_type = #tpu.core_type<tc>, window_params = [{transform_indices = @transform_0, window_bounds = array<i64: 256, 64>}, {pipeline_mode = #tpu.pipeline_mode<synchronous>, transform_indices = @transform_1, window_bounds = array<i64: 256, 64>}, {transform_indices = @transform_2, window_bounds = array<i64: 256, 256>}]} {
    %c0 = arith.constant 0 : index
    %c0_0 = arith.constant 0 : index
    %0 = vector.load %arg1[%c0, %c0_0] : memref<256x64xf32, #tpu.memory_space<vmem>>, vector<256x64xf32>
    %c0_1 = arith.constant 0 : index
    %c0_2 = arith.constant 0 : index
    %1 = vector.load %arg2[%c0_1, %c0_2] : memref<256x64xf32, #tpu.memory_space<vmem>>, vector<256x64xf32>
    %cst = arith.constant dense<0.000000e+00> : vector<256x256xf32>
    %2 = tpu.matmul %0, %1, %cst {dimension_numbers = #tpu.dot_dimension_numbers<[1], [1], [0], [0], [0, 0, 1, 0], [], []>} : vector<256x64xf32>, vector<256x64xf32>, vector<256x256xf32> -> vector<256x256xf32>
    %3 = arith.negf %2 : vector<256x256xf32>
    %4 = math.exp %3 : vector<256x256xf32>
    %cst_3 = arith.constant 1.000000e+00 : f32
    %5 = vector.broadcast %cst_3 : f32 to vector<256x256xf32>
    %6 = arith.addf %5, %4 : vector<256x256xf32>
    %7 = arith.divf %5, %6 : vector<256x256xf32>
    %c0_4 = arith.constant 0 : index
    %c0_5 = arith.constant 0 : index
    %8 = vector.load %arg3[%c0_4, %c0_5] : memref<256x256xf32, #tpu.memory_space<vmem>>, vector<256x256xf32>
    tpu.vector_store %arg3[%c0_4, %c0_5], %7 {strides = array<i32>} : memref<256x256xf32, #tpu.memory_space<vmem>>, vector<256x256xf32>,
    return
  }
  func.func @transform_0(%arg0: i32) -> (i32, i32) {
    %c0_i32 = arith.constant 0 : i32
    %c0_i32_0 = arith.constant 0 : i32
    return %arg0, %c0_i32 : i32, i32
  }
  func.func @transform_1(%arg0: i32) -> (i32, i32) {
    %c0_i32 = arith.constant 0 : i32
    %c0_i32_0 = arith.constant 0 : i32
    %c0_i32_1 = arith.constant 0 : i32
    return %c0_i32, %c0_i32_0 : i32, i32
  }
  func.func @transform_2(%arg0: i32) -> (i32, i32) {
    %c0_i32 = arith.constant 0 : i32
    %c0_i32_0 = arith.constant 0 : i32
    return %arg0, %c0_i32 : i32, i32
  }
}

</mosaic_0001>

<bundles_post_ra>
// kernel: tpu_custom_call.1
= control target key start
LH: loop header
LB: loop body
LE: loop exit
PB: predicated region body
PF: predicated region fallthrough
CT: control target
= control target key end

     0   :  { %vm76_vm0 = vcmask 523264   ;;  %s3538_s0 = inlined_call_operand.vmem [shape: f32[256,64], index: 0, kind: input, shape index: {}]   ;;  %s3539_s1 = inlined_call_operand.vmem [shape: f32[256,64], index: 1, kind: input, shape index: {}]   ;;  %s3540_s2 = inlined_call_operand.hbm [shape: f32[256,256], index: 2, kind: output, shape index: {}]  }
   0x1   :  { %v59_v0 = vld [vmem:[%s3539_s1 + $0x78] sm:$0xff]  ;;  %v58_v2 = vld [vmem:[%s3539_s1 + $0x70] sm:$0xff]  ;;  %v57_v4 = vld [vmem:[%s3539_s1 + $0x68] sm:$0xff] }
   0x2   :  { %v75_v1 = vld [vmem:[%s3539_s1 + $0xf8] sm:$0xff]  ;;  %1793 = vmatpush.xpose.msk.msra.mxu0 %vm76_vm0, %v59_v0  ;;  %1953 = vmatpush.xpose.msk.msra.mxu2 %vm76_vm0, %v59_v0  ;;  %v74_v3 = vld [vmem:[%s3539_s1 + $0xf0] sm:$0xff]  ;;  %v73_v5 = vld [vmem:[%s3539_s1 + $0xe8] sm:$0xff] }
   0x3   :  { %1841 = vmatpush.xpose.msk.msra.mxu1 %vm76_vm0, %v75_v1  ;;  %1969 = vmatpush.xpose.msk.msra.mxu3 %vm76_vm0, %v75_v1 }
   0x6   :  { %1794 = vmatpush.xpose.msk.msra.mxu0 %vm76_vm0, %v58_v2  ;;  %1954 = vmatpush.xpose.msk.msra.mxu2 %vm76_vm0, %v58_v2 }
   0x7   :  { %1842 = vmatpush.xpose.msk.msra.mxu1 %vm76_vm0, %v74_v3  ;;  %1970 = vmatpush.xpose.msk.msra.mxu3 %vm76_vm0, %v74_v3 }
   0x8   :  { %7 = vsyncpa [#allocation3], 0  ;;  %v56_v6 = vld [vmem:[%s3539_s1 + $0x60] sm:$0xff]  ;;  %v55_v8 = vld [vmem:[%s3539_s1 + $0x58] sm:$0xff]  ;;  %s1781_s25 = sshll.u32 %s3540_s2, 4  ;;  %s2271_s26 = smov 256   ;;  %s1782_s25 = int_to_ptr.hbm [resolvable:$true] %s1781_s25 }
   0x9   :  { %v72_v7 = vld [vmem:[%s3539_s1 + $0xe0] sm:$0xff]  ;;  %v71_v9 = vld [vmem:[%s3539_s1 + $0xd8] sm:$0xff]  ;;  %v54_v10 = vld [vmem:[%s3539_s1 + $0x50] sm:$0xff]  ;;  %s2272_s27 = smov 16  }
   0xa   :  { %1795 = vmatpush.xpose.msk.msra.mxu0 %vm76_vm0, %v57_v4  ;;  %1955 = vmatpush.xpose.msk.msra.mxu2 %vm76_vm0, %v57_v4  ;;  %v70_v11 = vld [vmem:[%s3539_s1 + $0xd0] sm:$0xff]  ;;  %v53_v12 = vld [vmem:[%s3539_s1 + $0x48] sm:$0xff]  ;;  %v52_v14 = vld [vmem:[%s3539_s1 + $0x40] sm:$0xff] }
   0xb   :  { %1843 = vmatpush.xpose.msk.msra.mxu1 %vm76_vm0, %v73_v5  ;;  %1971 = vmatpush.xpose.msk.msra.mxu3 %vm76_vm0, %v73_v5  ;;  %v69_v13 = vld [vmem:[%s3539_s1 + $0xc8] sm:$0xff]  ;;  %v68_v15 = vld [vmem:[%s3539_s1 + $0xc0] sm:$0xff]  ;;  %v51_v16 = vld [vmem:[%s3539_s1 + $0x38] sm:$0xff] }
   0xc   :  { %v67_v17 = vld [vmem:[%s3539_s1 + $0xb8] sm:$0xff]  ;;  %v50_v18 = vld [vmem:[%s3539_s1 + $0x30] sm:$0xff]  ;;  %v49_v20 = vld [vmem:[%s3539_s1 + $0x28] sm:$0xff] }
   0xd   :  { %v66_v19 = vld [vmem:[%s3539_s1 + $0xb0] sm:$0xff]  ;;  %v65_v21 = vld [vmem:[%s3539_s1 + $0xa8] sm:$0xff]  ;;  %v48_v22 = vld [vmem:[%s3539_s1 + $0x20] sm:$0xff] }
   0xe   :  { %1796 = vmatpush.xpose.msk.msra.mxu0 %vm76_vm0, %v56_v6  ;;  %1956 = vmatpush.xpose.msk.msra.mxu2 %vm76_vm0, %v56_v6  ;;  %v64_v23 = vld [vmem:[%s3539_s1 + $0xa0] sm:$0xff]  ;;  %v47_v24 = vld [vmem:[%s3539_s1 + $0x18] sm:$0xff]  ;;  %v46_v26 = vld [vmem:[%s3539_s1 + $0x10] sm:$0xff] }
   0xf   :  { %1844 = vmatpush.xpose.msk.msra.mxu1 %vm76_vm0, %v72_v7  ;;  %1972 = vmatpush.xpose.msk.msra.mxu3 %vm76_vm0, %v72_v7  ;;  %v63_v25 = vld [vmem:[%s3539_s1 + $0x98] sm:$0xff]  ;;  %v62_v27 = vld [vmem:[%s3539_s1 + $0x90] sm:$0xff]  ;;  %v45_v28 = vld [vmem:[%s3539_s1 + $0x8] sm:$0xff] }
  0x10   :  { %v61_v29 = vld [vmem:[%s3539_s1 + $0x88] sm:$0xff]  ;;  %v44_v30 = vld [vmem:[%s3539_s1] sm:$0xff]  ;;  %v14_v36 = vld [vmem:[%s3538_s0 + $0x10] sm:$0xff] }
  0x11   :  { %v60_v31 = vld [vmem:[%s3539_s1 + $0x80] sm:$0xff]  ;;  %v13_v34 = vld [vmem:[%s3538_s0 + $0x8] sm:$0xff]  ;;  %v30_v37 = vld [vmem:[%s3538_s0 + $0x90] sm:$0xff] }
  0x12   :  { %1797 = vmatpush.xpose.msk.msra.mxu0 %vm76_vm0, %v55_v8  ;;  %1957 = vmatpush.xpose.msk.msra.mxu2 %vm76_vm0, %v55_v8  ;;  %v12_v32 = vld [vmem:[%s3538_s0] sm:$0xff]  ;;  %v29_v35 = vld [vmem:[%s3538_s0 + $0x88] sm:$0xff]  ;;  %v15_v38 = vld [vmem:[%s3538_s0 + $0x18] sm:$0xff] }
  0x13   :  { %1845 = vmatpush.xpose.msk.msra.mxu1 %vm76_vm0, %v71_v9  ;;  %1973 = vmatpush.xpose.msk.msra.mxu3 %vm76_vm0, %v71_v9  ;;  %v28_v33 = vld [vmem:[%s3538_s0 + $0x80] sm:$0xff]  ;;  %v31_v39 = vld [vmem:[%s3538_s0 + $0x98] sm:$0xff]  ;;  %v17_v42 = vld [vmem:[%s3538_s0 + $0x28] sm:$0xff] }
  0x14   :  { %v16_v40 = vld [vmem:[%s3538_s0 + $0x20] sm:$0xff]  ;;  %v33_v43 = vld [vmem:[%s3538_s0 + $0xa8] sm:$0xff]  ;;  %v18_v44 = vld [vmem:[%s3538_s0 + $0x30] sm:$0xff] }
  0x15   :  { %v32_v41 = vld [vmem:[%s3538_s0 + $0xa0] sm:$0xff]  ;;  %v34_v45 = vld [vmem:[%s3538_s0 + $0xb0] sm:$0xff]  ;;  %v19_v46 = vld [vmem:[%s3538_s0 + $0x38] sm:$0xff] }
  0x16   :  { %1798 = vmatpush.xpose.msk.msra.mxu0 %vm76_vm0, %v54_v10  ;;  %1958 = vmatpush.xpose.msk.msra.mxu2 %vm76_vm0, %v54_v10  ;;  %v35_v47 = vld [vmem:[%s3538_s0 + $0xb8] sm:$0xff]  ;;  %v20_v48 = vld [vmem:[%s3538_s0 + $0x40] sm:$0xff]  ;;  %v21_v50 = vld [vmem:[%s3538_s0 + $0x48] sm:$0xff] }
  0x17   :  { %1846 = vmatpush.xpose.msk.msra.mxu1 %vm76_vm0, %v70_v11  ;;  %1974 = vmatpush.xpose.msk.msra.mxu3 %vm76_vm0, %v70_v11  ;;  %v36_v49 = vld [vmem:[%s3538_s0 + $0xc0] sm:$0xff]  ;;  %v37_v51 = vld [vmem:[%s3538_s0 + $0xc8] sm:$0xff]  ;;  %v22_v52 = vld [vmem:[%s3538_s0 + $0x50] sm:$0xff] }
  0x18   :  { %v38_v53 = vld [vmem:[%s3538_s0 + $0xd0] sm:$0xff]  ;;  %v23_v54 = vld [vmem:[%s3538_s0 + $0x58] sm:$0xff]  ;;  %v24_v56 = vld [vmem:[%s3538_s0 + $0x60] sm:$0xff] }
  0x19   :  { %v39_v55 = vld [vmem:[%s3538_s0 + $0xd8] sm:$0xff]  ;;  %v40_v57 = vld [vmem:[%s3538_s0 + $0xe0] sm:$0xff]  ;;  %v25_v58 = vld [vmem:[%s3538_s0 + $0x68] sm:$0xff] }
  0x1a   :  { %1799 = vmatpush.xpose.msk.msra.mxu0 %vm76_vm0, %v53_v12  ;;  %1959 = vmatpush.xpose.msk.msra.mxu2 %vm76_vm0, %v53_v12  ;;  %v41_v59 = vld [vmem:[%s3538_s0 + $0xe8] sm:$0xff]  ;;  %v26_v60 = vld [vmem:[%s3538_s0 + $0x70] sm:$0xff]  ;;  %v27_v62 = vld [vmem:[%s3538_s0 + $0x78] sm:$0xff] }
  0x1b   :  { %1847 = vmatpush.xpose.msk.msra.mxu1 %vm76_vm0, %v69_v13  ;;  %1975 = vmatpush.xpose.msk.msra.mxu3 %vm76_vm0, %v69_v13  ;;  %v42_v61 = vld [vmem:[%s3538_s0 + $0xf0] sm:$0xff]  ;;  %v43_v63 = vld [vmem:[%s3538_s0 + $0xf8] sm:$0xff]  ;;  %s2270_s0 = smov [#allocation2]  }
  0x1c   :  { %s1779_s22 = sshll.u32 %s2270_s0, 4  ;;  %s1780_s22 = int_to_ptr.vmem [resolvable:$true] %s1779_s22 }
  0x1e   :  { %1800 = vmatpush.xpose.msk.msra.mxu0 %vm76_vm0, %v52_v14  ;;  %1960 = vmatpush.xpose.msk.msra.mxu2 %vm76_vm0, %v52_v14 }
  0x1f   :  { %1848 = vmatpush.xpose.msk.msra.mxu1 %vm76_vm0, %v68_v15  ;;  %1976 = vmatpush.xpose.msk.msra.mxu3 %vm76_vm0, %v68_v15 }
  0x22   :  { %1801 = vmatpush.xpose.msk.msra.mxu0 %vm76_vm0, %v51_v16  ;;  %1961 = vmatpush.xpose.msk.msra.mxu2 %vm76_vm0, %v51_v16 }
  0x23   :  { %1849 = vmatpush.xpose.msk.msra.mxu1 %vm76_vm0, %v67_v17  ;;  %1977 = vmatpush.xpose.msk.msra.mxu3 %vm76_vm0, %v67_v17 }
  0x26   :  { %1802 = vmatpush.xpose.msk.msra.mxu0 %vm76_vm0, %v50_v18  ;;  %1962 = vmatpush.xpose.msk.msra.mxu2 %vm76_vm0, %v50_v18 }
  0x27   :  { %1850 = vmatpush.xpose.msk.msra.mxu1 %vm76_vm0, %v66_v19  ;;  %1978 = vmatpush.xpose.msk.msra.mxu3 %vm76_vm0, %v66_v19 }
  0x2a   :  { %1803 = vmatpush.xpose.msk.msra.mxu0 %vm76_vm0, %v49_v20  ;;  %1963 = vmatpush.xpose.msk.msra.mxu2 %vm76_vm0, %v49_v20 }
  0x2b   :  { %1851 = vmatpush.xpose.msk.msra.mxu1 %vm76_vm0, %v65_v21  ;;  %1979 = vmatpush.xpose.msk.msra.mxu3 %vm76_vm0, %v65_v21 }
  0x2e   :  { %1804 = vmatpush.xpose.msk.msra.mxu0 %vm76_vm0, %v48_v22  ;;  %1964 = vmatpush.xpose.msk.msra.mxu2 %vm76_vm0, %v48_v22 }
  0x2f   :  { %1852 = vmatpush.xpose.msk.msra.mxu1 %vm76_vm0, %v64_v23  ;;  %1980 = vmatpush.xpose.msk.msra.mxu3 %vm76_vm0, %v64_v23 }
  0x32   :  { %1805 = vmatpush.xpose.msk.msra.mxu0 %vm76_vm0, %v47_v24  ;;  %1965 = vmatpush.xpose.msk.msra.mxu2 %vm76_vm0, %v47_v24 }
  0x33   :  { %1853 = vmatpush.xpose.msk.msra.mxu1 %vm76_vm0, %v63_v25  ;;  %1981 = vmatpush.xpose.msk.msra.mxu3 %vm76_vm0, %v63_v25 }
  0x36   :  { %1806 = vmatpush.xpose.msk.msra.mxu0 %vm76_vm0, %v46_v26  ;;  %1966 = vmatpush.xpose.msk.msra.mxu2 %vm76_vm0, %v46_v26 }
  0x37   :  { %1854 = vmatpush.xpose.msk.msra.mxu1 %vm76_vm0, %v62_v27  ;;  %1982 = vmatpush.xpose.msk.msra.mxu3 %vm76_vm0, %v62_v27 }
  0x3a   :  { %1807 = vmatpush.xpose.msk.msra.mxu0 %vm76_vm0, %v45_v28  ;;  %1967 = vmatpush.xpose.msk.msra.mxu2 %vm76_vm0, %v45_v28 }
  0x3b   :  { %1855 = vmatpush.xpose.msk.msra.mxu1 %vm76_vm0, %v61_v29  ;;  %1983 = vmatpush.xpose.msk.msra.mxu3 %vm76_vm0, %v61_v29 }
  0x3e   :  { %1808 = vmatpush.xpose.msk.msra.mxu0 %vm76_vm0, %v44_v30  ;;  %1968 = vmatpush.xpose.msk.msra.mxu2 %vm76_vm0, %v44_v30 }
  0x3f   :  { %1856 = vmatpush.xpose.msk.msra.mxu1 %vm76_vm0, %v60_v31  ;;  %1984 = vmatpush.xpose.msk.msra.mxu3 %vm76_vm0, %v60_v31 }
  0x41   :  { %1809 = vmatmul.msk.f32.vlgmr.msra.gmra.mxu0 %vm76_vm0, %v12_v32  ;;  %1825 = vmatmul.msk.f32.vlgmr.msra.gmra.mxu2 %vm76_vm0, %v28_v33 }
  0x42   :  { %1857 = vmatmul.msk.f32.vlgmr.msra.gmra.mxu1 %vm76_vm0, %v12_v32  ;;  %1873 = vmatmul.msk.f32.vlgmr.msra.gmra.mxu3 %vm76_vm0, %v28_v33 }
  0x49   :  { %1810 = vmatmul.msk.f32.gmra.mxu0 %vm76_vm0, %v13_v34  ;;  %1826 = vmatmul.msk.f32.gmra.mxu2 %vm76_vm0, %v29_v35 }
  0x4a   :  { %1858 = vmatmul.msk.f32.gmra.mxu1 %vm76_vm0, %v13_v34  ;;  %1874 = vmatmul.msk.f32.gmra.mxu3 %vm76_vm0, %v29_v35 }
  0x51   :  { %1811 = vmatmul.msk.f32.gmra.mxu0 %vm76_vm0, %v14_v36  ;;  %1827 = vmatmul.msk.f32.gmra.mxu2 %vm76_vm0, %v30_v37 }
  0x52   :  { %1859 = vmatmul.msk.f32.gmra.mxu1 %vm76_vm0, %v14_v36  ;;  %1875 = vmatmul.msk.f32.gmra.mxu3 %vm76_vm0, %v30_v37 }
  0x59   :  { %1812 = vmatmul.msk.f32.gmra.mxu0 %vm76_vm0, %v15_v38  ;;  %1828 = vmatmul.msk.f32.gmra.mxu2 %vm76_vm0, %v31_v39 }
  0x5a   :  { %1860 = vmatmul.msk.f32.gmra.mxu1 %vm76_vm0, %v15_v38  ;;  %1876 = vmatmul.msk.f32.gmra.mxu3 %vm76_vm0, %v31_v39 }
  0x61   :  { %1813 = vmatmul.msk.f32.gmra.mxu0 %vm76_vm0, %v16_v40  ;;  %1829 = vmatmul.msk.f32.gmra.mxu2 %vm76_vm0, %v32_v41 }
  0x62   :  { %1861 = vmatmul.msk.f32.gmra.mxu1 %vm76_vm0, %v16_v40  ;;  %1877 = vmatmul.msk.f32.gmra.mxu3 %vm76_vm0, %v32_v41 }
  0x69   :  { %1814 = vmatmul.msk.f32.gmra.mxu0 %vm76_vm0, %v17_v42  ;;  %1830 = vmatmul.msk.f32.gmra.mxu2 %vm76_vm0, %v33_v43 }
  0x6a   :  { %1862 = vmatmul.msk.f32.gmra.mxu1 %vm76_vm0, %v17_v42  ;;  %1878 = vmatmul.msk.f32.gmra.mxu3 %vm76_vm0, %v33_v43 }
  0x71   :  { %1815 = vmatmul.msk.f32.gmra.mxu0 %vm76_vm0, %v18_v44  ;;  %1831 = vmatmul.msk.f32.gmra.mxu2 %vm76_vm0, %v34_v45 }
  0x72   :  { %1863 = vmatmul.msk.f32.gmra.mxu1 %vm76_vm0, %v18_v44  ;;  %1879 = vmatmul.msk.f32.gmra.mxu3 %vm76_vm0, %v34_v45 }
  0x79   :  { %1816 = vmatmul.msk.f32.gmra.mxu0 %vm76_vm0, %v19_v46  ;;  %1832 = vmatmul.msk.f32.gmra.mxu2 %vm76_vm0, %v35_v47 }
  0x7a   :  { %1864 = vmatmul.msk.f32.gmra.mxu1 %vm76_vm0, %v19_v46  ;;  %1880 = vmatmul.msk.f32.gmra.mxu3 %vm76_vm0, %v35_v47 }
  0x81   :  { %1817 = vmatmul.msk.f32.gmra.mxu0 %vm76_vm0, %v20_v48  ;;  %1833 = vmatmul.msk.f32.gmra.mxu2 %vm76_vm0, %v36_v49 }
  0x82   :  { %1865 = vmatmul.msk.f32.gmra.mxu1 %vm76_vm0, %v20_v48  ;;  %1881 = vmatmul.msk.f32.gmra.mxu3 %vm76_vm0, %v36_v49 }
  0x89   :  { %1818 = vmatmul.msk.f32.gmra.mxu0 %vm76_vm0, %v21_v50  ;;  %1834 = vmatmul.msk.f32.gmra.mxu2 %vm76_vm0, %v37_v51 }
  0x8a   :  { %1866 = vmatmul.msk.f32.gmra.mxu1 %vm76_vm0, %v21_v50  ;;  %1882 = vmatmul.msk.f32.gmra.mxu3 %vm76_vm0, %v37_v51 }
  0x91   :  { %1819 = vmatmul.msk.f32.gmra.mxu0 %vm76_vm0, %v22_v52  ;;  %1835 = vmatmul.msk.f32.gmra.mxu2 %vm76_vm0, %v38_v53 }
  0x92   :  { %1867 = vmatmul.msk.f32.gmra.mxu1 %vm76_vm0, %v22_v52  ;;  %1883 = vmatmul.msk.f32.gmra.mxu3 %vm76_vm0, %v38_v53 }
  0x99   :  { %1820 = vmatmul.msk.f32.gmra.mxu0 %vm76_vm0, %v23_v54  ;;  %1836 = vmatmul.msk.f32.gmra.mxu2 %vm76_vm0, %v39_v55 }
  0x9a   :  { %1868 = vmatmul.msk.f32.gmra.mxu1 %vm76_vm0, %v23_v54  ;;  %1884 = vmatmul.msk.f32.gmra.mxu3 %vm76_vm0, %v39_v55 }
  0xa1   :  { %1821 = vmatmul.msk.f32.gmra.mxu0 %vm76_vm0, %v24_v56  ;;  %1837 = vmatmul.msk.f32.gmra.mxu2 %vm76_vm0, %v40_v57 }
  0xa2   :  { %1869 = vmatmul.msk.f32.gmra.mxu1 %vm76_vm0, %v24_v56  ;;  %1885 = vmatmul.msk.f32.gmra.mxu3 %vm76_vm0, %v40_v57 }
  0xa9   :  { %1822 = vmatmul.msk.f32.gmra.mxu0 %vm76_vm0, %v25_v58  ;;  %1838 = vmatmul.msk.f32.gmra.mxu2 %vm76_vm0, %v41_v59 }
  0xaa   :  { %1870 = vmatmul.msk.f32.gmra.mxu1 %vm76_vm0, %v25_v58  ;;  %1886 = vmatmul.msk.f32.gmra.mxu3 %vm76_vm0, %v41_v59 }
  0xb1   :  { %1823 = vmatmul.msk.f32.gmra.mxu0 %vm76_vm0, %v26_v60  ;;  %1839 = vmatmul.msk.f32.gmra.mxu2 %vm76_vm0, %v42_v61 }
  0xb2   :  { %1871 = vmatmul.msk.f32.gmra.mxu1 %vm76_vm0, %v26_v60  ;;  %1887 = vmatmul.msk.f32.gmra.mxu3 %vm76_vm0, %v42_v61 }
  0xb9   :  { %1824 = vmatmul.msk.f32.gmra.mxu0 %vm76_vm0, %v27_v62  ;;  %1840 = vmatmul.msk.f32.gmra.mxu2 %vm76_vm0, %v43_v63 }
  0xba   :  { %1872 = vmatmul.msk.f32.gmra.mxu1 %vm76_vm0, %v27_v62  ;;  %1888 = vmatmul.msk.f32.gmra.mxu3 %vm76_vm0, %v43_v63 }
  0xbe   :  { %v286_v0 = vpop.f32.mrf.mxu0 }
  0xbf   :  { %v1889_v1 = vmul.f32 -1.442695, %v286_v0  ;;  %v399_v2 = vpop.f32.mrf.mxu1 }
  0xc0   :  { %v1890_v3 = vmul.f32 -1.442695, %v399_v2 }
  0xc1   :  { %1988 = vpow2.f32 %v1889_v1 }
  0xc2   :  { %1990 = vpow2.f32 %v1890_v3 }
  0xc4   :  { %v334_v4 = vpop.f32.mrf.mxu2 }
  0xc5   :  { %v1921_v5 = vmul.f32 -1.442695, %v334_v4  ;;  %v447_v6 = vpop.f32.mrf.mxu3 }
  0xc6   :  { %v1922_v7 = vmul.f32 -1.442695, %v447_v6  ;;  %v289_v8 = vpop.f32.mrf.mxu0 }
  0xc7   :  { %v1989_v9 = vpop.eup %1988  ;;  %1992 = vpow2.f32 %v1921_v5  ;;  %v1891_v10 = vmul.f32 -1.442695, %v289_v8  ;;  %v402_v11 = vpop.f32.mrf.mxu1 }
  0xc8   :  { %v1991_v12 = vpop.eup %1990  ;;  %v687_v13 = vadd.f32 1.0, %v1989_v9  ;;  %1994 = vpow2.f32 %v1922_v7  ;;  %v1892_v14 = vmul.f32 -1.442695, %v402_v11 }
  0xc9   :  { %v2608_v15 = vadd.f32 1.0, %v1991_v12  ;;  %1996 = vpow2.f32 %v1891_v10 }
  0xca   :  { %1998 = vrcp.f32 %v687_v13  ;;  %v760_v18 = vand.u32 2147483647, %v687_v13  ;;  %v762_v19 = vand.u32 2147483648, %v687_v13  ;;  %vm756_vm1 = vweird.f32 %v687_v13 }
  0xcb   :  { %2000 = vrcp.f32 %v2608_v15  ;;  %v775_v21 = vand.u32 2147483647, %v2608_v15  ;;  %v777_v25 = vand.u32 2147483648, %v2608_v15  ;;  %vm771_vm2 = vweird.f32 %v2608_v15 }
  0xcc   :  { %2002 = vpow2.f32 %v1892_v14  ;;  %v337_v16 = vpop.f32.mrf.mxu2  ;;  %vm2619_vm3 = vcmp.eq.f32.partialorder %v760_v18, 8.507059e+37  ;;  %v763_v33 = vor.u32 1.1754944e-38, %v762_v19 }
  0xcd   :  { %v1993_v17 = vpop.eup %1992  ;;  %v1923_v23 = vmul.f32 -1.442695, %v337_v16  ;;  %v450_v27 = vpop.f32.mrf.mxu3  ;;  %vm2625_vm4 = vcmp.eq.f32.partialorder %v775_v21, 8.507059e+37  ;;  %v778_v39 = vor.u32 1.1754944e-38, %v777_v25 }
  0xce   :  { %v1995_v20 = vpop.eup %1994  ;;  %v2612_v22 = vadd.f32 1.0, %v1993_v17  ;;  %v292_v29 = vpop.f32.mrf.mxu0  ;;  %v1924_v37 = vmul.f32 -1.442695, %v450_v27 }
  0xcf   :  { %v1997_v24 = vpop.eup %1996  ;;  %v2615_v26 = vadd.f32 1.0, %v1995_v20  ;;  %v2631_v41 = vmul.f32 -1.442695, %v292_v29  ;;  %v405_v51 = vpop.f32.mrf.mxu1 }
  0xd0   :  { %v1999_v28 = vpop.eup %1998  ;;  %2004 = vrcp.f32 %v2612_v22  ;;  %v2629_v40 = vadd.f32 1.0, %v1997_v24  ;;  %v1240_v43 = vand.u32 2147483647, %v2612_v22  ;;  %v1242_v44 = vand.u32 2147483648, %v2612_v22 }
  0xd1   :  { %v2001_v30 = vpop.eup %2000  ;;  %v752_v31 = vmul.f32 %v1999_v28, %v687_v13  ;;  %2006 = vrcp.f32 %v2615_v26  ;;  %vm757_vm5 = vweird.f32 %v1999_v28  ;;  %vm1236_vm6 = vweird.f32 %v2612_v22 }
  0xd2   :  { %v2003_v34 = vpop.eup %2002  ;;  %v767_v35 = vmul.f32 %v2001_v30, %v2608_v15  ;;  %2008 = vpow2.f32 %v1923_v23  ;;  %v1255_v47 = vand.u32 2147483647, %v2615_v26  ;;  %vm772_vm7 = vweird.f32 %v2001_v30  ;;  %vm758_vm9 = vmor %vm756_vm1, %vm757_vm5 }
  0xd3   :  { %v753_v38 = vsub.f32 1.0, %v752_v31  ;;  %v2635_v45 = vadd.f32 1.0, %v2003_v34  ;;  %2010 = vrcp.f32 %v2629_v40  ;;  %v1257_v50 = vand.u32 2147483648, %v2615_v26  ;;  %vm773_vm11 = vmor %vm771_vm2, %vm772_vm7 }
  0xd4   :  { %v768_v42 = vsub.f32 1.0, %v767_v35  ;;  %2012 = vpow2.f32 %v1924_v37  ;;  %vm1251_vm8 = vweird.f32 %v2615_v26  ;;  %vm2646_vm10 = vcmp.eq.f32.partialorder %v1240_v43, 8.507059e+37  ;;  %v340_v4 = vpop.f32.mrf.mxu2 }
  0xd5   :  { %v754_v46 = vmul.f32 %v1999_v28, %v753_v38  ;;  %2014 = vrcp.f32 %v2635_v45  ;;  %v1243_v58 = vor.u32 1.1754944e-38, %v1242_v44  ;;  %vm2654_vm12 = vcmp.eq.f32.partialorder %v1255_v47, 8.507059e+37  ;;  %v453_v12 = vpop.f32.mrf.mxu3 }
  0xd6   :  { %v2005_v48 = vpop.eup %2004  ;;  %v769_v49 = vmul.f32 %v2001_v30, %v768_v42  ;;  %v2658_v63 = vmul.f32 -1.442695, %v405_v51  ;;  %v1258_v3 = vor.u32 1.1754944e-38, %v1257_v50  ;;  %vm786_vm15 = vweird.f32 %v2629_v40  ;;  %v295_v17 = vpop.f32.mrf.mxu0 }
  0xd7   :  { %v2007_v52 = vpop.eup %2006  ;;  %v755_v53 = vadd.f32 %v1999_v28, %v754_v46  ;;  %v1232_v54 = vmul.f32 %v2005_v48, %v2612_v22  ;;  %vm1237_vm13 = vweird.f32 %v2005_v48  ;;  %v790_v15 = vand.u32 2147483647, %v2629_v40  ;;  %v408_v44 = vpop.f32.mrf.mxu1 }
  0xd8   :  { %v2009_v55 = vpop.eup %2008  ;;  %v770_v56 = vadd.f32 %v2001_v30, %v769_v49  ;;  %v1247_v59 = vmul.f32 %v2007_v52, %v2615_v26  ;;  %vm1252_vm14 = vweird.f32 %v2007_v52  ;;  %v792_v16 = vand.u32 2147483648, %v2629_v40  ;;  %vm1238_vm0 = vmor %vm1236_vm6, %vm1237_vm13 }
  0xd9   :  { %v759_v60 = vsel %vm758_vm9, %v1999_v28, %v755_v53  ;;  %v1233_v61 = vsub.f32 1.0, %v1232_v54  ;;  %v2011_v5 = vpop.eup %2010  ;;  %v2664_v8 = vadd.f32 1.0, %v2009_v55  ;;  %v805_v21 = vand.u32 2147483647, %v2635_v45  ;;  %vm1253_vm1 = vmor %vm1251_vm8, %vm1252_vm14 }
  0xda   :  { %v764_v0 = vsel %vm2619_vm3, %v763_v33, %v759_v60  ;;  %v774_v1 = vsel %vm773_vm11, %v2001_v30, %v770_v56  ;;  %v1248_v2 = vsub.f32 1.0, %v1247_v59  ;;  %v2013_v9 = vpop.eup %2012  ;;  %v782_v11 = vmul.f32 %v2011_v5, %v2629_v40 }
  0xdb   :  { %1711 = vst [vmem:[#allocation2] sm:$0xff] %v764_v0  ;;  %v779_v6 = vsel %vm2625_vm4, %v778_v39, %v774_v1  ;;  %v1234_v7 = vmul.f32 %v2005_v48, %v1233_v61  ;;  %v2015_v13 = vpop.eup %2014  ;;  %2016 = vrcp.f32 %v2664_v8  ;;  %vm787_vm2 = vweird.f32 %v2011_v5 }
  0xdc   :  { %1712 = vst [vmem:[#allocation2 + $0x8] sm:$0xff] %v779_v6  ;;  %v1249_v10 = vmul.f32 %v2007_v52, %v1248_v2  ;;  %v783_v19 = vsub.f32 1.0, %v782_v11  ;;  %v797_v20 = vmul.f32 %v2015_v13, %v2635_v45  ;;  %v807_v24 = vand.u32 2147483648, %v2635_v45  ;;  %vm788_vm6 = vmor %vm786_vm15, %vm787_vm2  ;;  %v343_v46 = vpop.f32.mrf.mxu2 }
  0xdd   :  { %v1235_v14 = vadd.f32 %v2005_v48, %v1234_v7  ;;  %v2680_v25 = vadd.f32 1.0, %v2013_v9  ;;  %vm2686_vm3 = vcmp.eq.f32.partialorder %v790_v15, 8.507059e+37  ;;  %v793_v26 = vor.u32 1.1754944e-38, %v792_v16  ;;  %v456_v51 = vpop.f32.mrf.mxu3 }
  0xde   :  { %v1250_v18 = vadd.f32 %v2007_v52, %v1249_v10  ;;  %v784_v28 = vmul.f32 %v2011_v5, %v783_v19  ;;  %v798_v29 = vsub.f32 1.0, %v797_v20  ;;  %vm801_vm4 = vweird.f32 %v2635_v45  ;;  %v298_v55 = vpop.f32.mrf.mxu0 }
  0xdf   :  { %v1239_v23 = vsel %vm1238_vm0, %v2005_v48, %v1235_v14  ;;  %2018 = vrcp.f32 %v2680_v25  ;;  %vm802_vm5 = vweird.f32 %v2015_v13  ;;  %vm2695_vm7 = vcmp.eq.f32.partialorder %v805_v21, 8.507059e+37 }
  0xe0   :  { %v1244_v22 = vsel %vm2646_vm10, %v1243_v58, %v1239_v23  ;;  %v1254_v27 = vsel %vm1253_vm1, %v2007_v52, %v1250_v18  ;;  %v785_v32 = vadd.f32 %v2011_v5, %v784_v28  ;;  %v799_v33 = vmul.f32 %v2015_v13, %v798_v29  ;;  %vm803_vm8 = vmor %vm801_vm4, %vm802_vm5 }
  0xe1   :  { %1743 = vst [vmem:[#allocation2 + $0x100] sm:$0xff] %v1244_v22  ;;  %v1259_v30 = vsel %vm2654_vm12, %v1258_v3, %v1254_v27  ;;  %v2017_v34 = vpop.eup %2016  ;;  %2020 = vpow2.f32 %v2631_v41  ;;  %v1925_v36 = vmul.f32 -1.442695, %v340_v4  ;;  %v1926_v37 = vmul.f32 -1.442695, %v453_v12 }
  0xe2   :  { %1744 = vst [vmem:[#allocation2 + $0x108] sm:$0xff] %v1259_v30  ;;  %v789_v38 = vsel %vm788_vm6, %v2011_v5, %v785_v32  ;;  %v800_v39 = vadd.f32 %v2015_v13, %v799_v33  ;;  %v808_v42 = vor.u32 1.1754944e-38, %v807_v24  ;;  %v1262_v43 = vmul.f32 %v2017_v34, %v2664_v8 }
  0xe3   :  { %v794_v47 = vsel %vm2686_vm3, %v793_v26, %v789_v38  ;;  %v1270_v40 = vand.u32 2147483647, %v2664_v8  ;;  %v1272_v48 = vand.u32 2147483648, %v2664_v8  ;;  %2022 = vpow2.f32 %v2658_v63 }
  0xe4   :  { %1713 = vst [vmem:[#allocation2 + $0x10] sm:$0xff] %v794_v47  ;;  %v804_v41 = vsel %vm803_vm8, %v2015_v13, %v800_v39  ;;  %v1263_v49 = vsub.f32 1.0, %v1262_v43  ;;  %2024 = vpow2.f32 %v1925_v36  ;;  %v1895_v50 = vmul.f32 -1.442695, %v295_v17  ;;  %v411_v17 = vpop.f32.mrf.mxu1  ;;  %v346_v21 = vpop.f32.mrf.mxu2 }
  0xe5   :  { %v2019_v52 = vpop.eup %2018  ;;  %v809_v53 = vsel %vm2695_vm7, %v808_v42, %v804_v41  ;;  %2026 = vpow2.f32 %v1926_v37  ;;  %v1896_v54 = vmul.f32 -1.442695, %v408_v44  ;;  %v1927_v45 = vmul.f32 -1.442695, %v343_v46  ;;  %v459_v23 = vpop.f32.mrf.mxu3 }
  0xe6   :  { %1714 = vst [vmem:[#allocation2 + $0x18] sm:$0xff] %v809_v53  ;;  %v1264_v56 = vmul.f32 %v2017_v34, %v1263_v49  ;;  %vm1267_vm9 = vweird.f32 %v2017_v34  ;;  %v1277_v57 = vmul.f32 %v2019_v52, %v2680_v25  ;;  %2028 = vpow2.f32 %v1895_v50 }
  0xe7   :  { %v2021_v58 = vpop.eup %2020  ;;  %vm1266_vm10 = vweird.f32 %v2664_v8  ;;  %vm2712_vm11 = vcmp.eq.f32.partialorder %v1270_v40, 8.507059e+37  ;;  %2030 = vpow2.f32 %v1896_v54  ;;  %v1928_v60 = vmul.f32 -1.442695, %v456_v51 }
  0xe8   :  { %v1265_v61 = vadd.f32 %v2017_v34, %v1264_v56  ;;  %v1278_v62 = vsub.f32 1.0, %v1277_v57  ;;  %v2716_v63 = vadd.f32 1.0, %v2021_v58  ;;  %v1897_v0 = vmul.f32 -1.442695, %v298_v55  ;;  %vm1268_vm12 = vmor %vm1266_vm10, %vm1267_vm9 }
  0xe9   :  { %v2023_v1 = vpop.eup %2022  ;;  %v1273_v2 = vor.u32 1.1754944e-38, %v1272_v48  ;;  %v1285_v3 = vand.u32 2147483647, %v2680_v25  ;;  %v1287_v4 = vand.u32 2147483648, %v2680_v25  ;;  %2032 = vpow2.f32 %v1927_v45 }
  0xea   :  { %v2025_v5 = vpop.eup %2024  ;;  %v1269_v6 = vsel %vm1268_vm12, %v2017_v34, %v1265_v61  ;;  %v1279_v7 = vmul.f32 %v2019_v52, %v1278_v62  ;;  %vm1282_vm13 = vweird.f32 %v2019_v52  ;;  %2034 = vrcp.f32 %v2716_v63 }
  0xeb   :  { %v2027_v8 = vpop.eup %2026  ;;  %v1274_v9 = vsel %vm2712_vm11, %v1273_v2, %v1269_v6  ;;  %vm1281_vm14 = vweird.f32 %v2680_v25  ;;  %v2724_v10 = vadd.f32 1.0, %v2023_v1  ;;  %2036 = vpow2.f32 %v1928_v60 }
  0xec   :  { %v2029_v11 = vpop.eup %2028  ;;  %1745 = vst [vmem:[#allocation2 + $0x110] sm:$0xff] %v1274_v9  ;;  %v1280_v12 = vadd.f32 %v2019_v52, %v1279_v7  ;;  %v2726_v13 = vadd.f32 1.0, %v2025_v5  ;;  %v2728_v14 = vadd.f32 1.0, %v2027_v8  ;;  %2038 = vpow2.f32 %v1897_v0  ;;  %vm1283_vm15 = vmor %vm1281_vm14, %vm1282_vm13 }
  0xed   :  { %v2031_v15 = vpop.eup %2030  ;;  %vm1286_vm0 = vcmp.eq.f32.partialorder %v1285_v3, 8.507059e+37  ;;  %v1288_v16 = vor.u32 1.1754944e-38, %v1287_v4  ;;  %2040 = vrcp.f32 %v2724_v10  ;;  %v820_v19 = vand.u32 2147483647, %v2716_v63 }
  0xee   :  { %v1284_v18 = vsel %vm1283_vm15, %v2019_v52, %v1280_v12  ;;  %v822_v20 = vand.u32 2147483648, %v2716_v63  ;;  %2042 = vrcp.f32 %v2726_v13  ;;  %v837_v22 = vand.u32 2147483648, %v2724_v10 }
  0xef   :  { %v2033_v24 = vpop.eup %2032  ;;  %v1289_v25 = vsel %vm1286_vm0, %v1288_v16, %v1284_v18  ;;  %v835_v28 = vand.u32 2147483647, %v2724_v10  ;;  %v1302_v29 = vand.u32 2147483648, %v2726_v13  ;;  %2044 = vrcp.f32 %v2728_v14 }
  0xf0   :  { %v2035_v27 = vpop.eup %2034  ;;  %1746 = vst [vmem:[#allocation2 + $0x118] sm:$0xff] %v1289_v25  ;;  %v2738_v30 = vmul.f32 -1.442695, %v411_v17  ;;  %v1300_v32 = vand.u32 2147483647, %v2726_v13  ;;  %vm816_vm1 = vweird.f32 %v2716_v63  ;;  %vm2747_vm2 = vcmp.eq.f32.partialorder %v820_v19, 8.507059e+37  ;;  %v301_v25 = vpop.f32.mrf.mxu0 }
  0xf1   :  { %v2037_v31 = vpop.eup %2036  ;;  %v812_v26 = vmul.f32 %v2035_v27, %v2716_v63  ;;  %v2742_v33 = vmul.f32 -1.442695, %v346_v21  ;;  %v2744_v34 = vmul.f32 -1.442695, %v459_v23  ;;  %v823_v37 = vor.u32 1.1754944e-38, %v822_v20 }
  0xf2   :  { %v2039_v35 = vpop.eup %2038  ;;  %v2751_v38 = vadd.f32 1.0, %v2029_v11  ;;  %vm831_vm3 = vweird.f32 %v2724_v10  ;;  %v838_v43 = vor.u32 1.1754944e-38, %v837_v22  ;;  %vm1296_vm4 = vweird.f32 %v2726_v13 }
  0xf3   :  { %v2041_v39 = vpop.eup %2040  ;;  %v813_v42 = vsub.f32 1.0, %v812_v26  ;;  %vm817_vm5 = vweird.f32 %v2035_v27  ;;  %vm2756_vm6 = vcmp.eq.f32.partialorder %v835_v28, 8.507059e+37  ;;  %v1303_v40 = vor.u32 1.1754944e-38, %v1302_v29 }
  0xf4   :  { %v2043_v44 = vpop.eup %2042  ;;  %v827_v46 = vmul.f32 %v2041_v39, %v2724_v10  ;;  %v2760_v48 = vadd.f32 1.0, %v2031_v15  ;;  %vm2763_vm7 = vcmp.eq.f32.partialorder %v1300_v32, 8.507059e+37  ;;  %vm1311_vm8 = vweird.f32 %v2728_v14  ;;  %vm818_vm9 = vmor %vm816_vm1, %vm817_vm5 }
  0xf5   :  { %v814_v41 = vmul.f32 %v2035_v27, %v813_v42  ;;  %v1292_v49 = vmul.f32 %v2043_v44, %v2726_v13  ;;  %v1315_v51 = vand.u32 2147483647, %v2728_v14  ;;  %2046 = vrcp.f32 %v2751_v38  ;;  %v2045_v52 = vpop.eup %2044  ;;  %v414_v42 = vpop.f32.mrf.mxu1 }
  0xf6   :  { %v828_v53 = vsub.f32 1.0, %v827_v46  ;;  %v1317_v54 = vand.u32 2147483648, %v2728_v14  ;;  %v2771_v45 = vadd.f32 1.0, %v2033_v24  ;;  %v2773_v55 = vadd.f32 1.0, %v2037_v31 }
  0xf7   :  { %v815_v56 = vadd.f32 %v2035_v27, %v814_v41  ;;  %v1293_v57 = vsub.f32 1.0, %v1292_v49  ;;  %v1307_v58 = vmul.f32 %v2045_v52, %v2728_v14  ;;  %v2776_v59 = vadd.f32 1.0, %v2039_v35 }
  0xf8   :  { %v829_v60 = vmul.f32 %v2041_v39, %v828_v53  ;;  %vm832_vm10 = vweird.f32 %v2041_v39  ;;  %vm1297_vm11 = vweird.f32 %v2043_v44  ;;  %2048 = vrcp.f32 %v2760_v48 }
  0xf9   :  { %v819_v61 = vsel %vm818_vm9, %v2035_v27, %v815_v56  ;;  %v1294_v62 = vmul.f32 %v2043_v44, %v1293_v57  ;;  %v1308_v0 = vsub.f32 1.0, %v1307_v58  ;;  %v850_v1 = vand.u32 2147483647, %v2751_v38  ;;  %vm833_vm13 = vmor %vm831_vm3, %vm832_vm10  ;;  %v462_v57 = vpop.f32.mrf.mxu3 }
  0xfa   :  { %v824_v2 = vsel %vm2747_vm2, %v823_v37, %v819_v61  ;;  %v830_v3 = vadd.f32 %v2041_v39, %v829_v60  ;;  %vm2785_vm12 = vcmp.eq.f32.partialorder %v1315_v51, 8.507059e+37  ;;  %v1318_v63 = vor.u32 1.1754944e-38, %v1317_v54  ;;  %vm1298_vm15 = vmor %vm1296_vm4, %vm1297_vm11 }
  0xfb   :  { %v2047_v5 = vpop.eup %2046  ;;  %1715 = vst [vmem:[#allocation2 + $0x20] sm:$0xff] %v824_v2  ;;  %v1295_v6 = vadd.f32 %v2043_v44, %v1294_v62  ;;  %v1309_v7 = vmul.f32 %v2045_v52, %v1308_v0  ;;  %vm1312_vm14 = vweird.f32 %v2045_v52  ;;  %2050 = vrcp.f32 %v2771_v45  ;;  %v304_v0 = vpop.f32.mrf.mxu0 }
  0xfc   :  { %v834_v8 = vsel %vm833_vm13, %v2041_v39, %v830_v3  ;;  %v842_v9 = vmul.f32 %v2047_v5, %v2751_v38  ;;  %vm846_vm0 = vweird.f32 %v2751_v38  ;;  %v852_v11 = vand.u32 2147483648, %v2751_v38  ;;  %vm1313_vm2 = vmor %vm1311_vm8, %vm1312_vm14 }
  0xfd   :  { %v839_v10 = vsel %vm2756_vm6, %v838_v43, %v834_v8  ;;  %v1299_v12 = vsel %vm1298_vm15, %v2043_v44, %v1295_v6  ;;  %v1310_v15 = vadd.f32 %v2045_v52, %v1309_v7  ;;  %vm2800_vm1 = vcmp.eq.f32.partialorder %v850_v1, 8.507059e+37 }
  0xfe   :  { %v2049_v17 = vpop.eup %2048  ;;  %1716 = vst [vmem:[#allocation2 + $0x28] sm:$0xff] %v839_v10  ;;  %v1304_v13 = vsel %vm2763_vm7, %v1303_v40, %v1299_v12  ;;  %v843_v18 = vsub.f32 1.0, %v842_v9  ;;  %v865_v19 = vand.u32 2147483647, %v2760_v48  ;;  %v867_v20 = vand.u32 2147483648, %v2760_v48  ;;  %v417_v10 = vpop.f32.mrf.mxu1 }
  0xff   :  { %1747 = vst [vmem:[#allocation2 + $0x120] sm:$0xff] %v1304_v13  ;;  %v1314_v21 = vsel %vm1313_vm2, %v2045_v52, %v1310_v15  ;;  %v857_v23 = vmul.f32 %v2049_v17, %v2760_v48  ;;  %v1330_v24 = vand.u32 2147483647, %v2771_v45  ;;  %2052 = vrcp.f32 %v2773_v55  ;;  %v349_v52 = vpop.f32.mrf.mxu2 }
 0x100   :  { %v1319_v22 = vsel %vm2785_vm12, %v1318_v63, %v1314_v21  ;;  %v844_v27 = vmul.f32 %v2047_v5, %v843_v18  ;;  %vm847_vm3 = vweird.f32 %v2047_v5  ;;  %v1332_v14 = vand.u32 2147483648, %v2771_v45 }
 0x101   :  { %v2051_v28 = vpop.eup %2050  ;;  %1748 = vst [vmem:[#allocation2 + $0x128] sm:$0xff] %v1319_v22  ;;  %v853_v29 = vor.u32 1.1754944e-38, %v852_v11  ;;  %v858_v31 = vsub.f32 1.0, %v857_v23  ;;  %vm861_vm4 = vweird.f32 %v2760_v48  ;;  %vm1326_vm5 = vweird.f32 %v2771_v45  ;;  %vm848_vm7 = vmor %vm846_vm0, %vm847_vm3  ;;  %v465_v22 = vpop.f32.mrf.mxu3 }
 0x102   :  { %v845_v26 = vadd.f32 %v2047_v5, %v844_v27  ;;  %vm2818_vm6 = vcmp.eq.f32.partialorder %v865_v19, 8.507059e+37  ;;  %v1322_v35 = vmul.f32 %v2051_v28, %v2771_v45  ;;  %2054 = vrcp.f32 %v2776_v59 }
 0x103   :  { %v859_v36 = vmul.f32 %v2049_v17, %v858_v31  ;;  %vm862_vm8 = vweird.f32 %v2049_v17  ;;  %v868_v37 = vor.u32 1.1754944e-38, %v867_v20  ;;  %vm2826_vm9 = vcmp.eq.f32.partialorder %v1330_v24, 8.507059e+37 }
 0x104   :  { %v849_v43 = vsel %vm848_vm7, %v2047_v5, %v845_v26  ;;  %v1323_v44 = vsub.f32 1.0, %v1322_v35  ;;  %v1333_v46 = vor.u32 1.1754944e-38, %v1332_v14  ;;  %v1347_v47 = vand.u32 2147483648, %v2773_v55  ;;  %vm863_vm10 = vmor %vm861_vm4, %vm862_vm8 }
 0x105   :  { %v2053_v40 = vpop.eup %2052  ;;  %v854_v41 = vsel %vm2800_vm1, %v853_v29, %v849_v43  ;;  %v860_v49 = vadd.f32 %v2049_v17, %v859_v36  ;;  %2056 = vpow2.f32 %v2738_v30  ;;  %v1899_v38 = vmul.f32 -1.442695, %v301_v25 }
 0x106   :  { %1717 = vst [vmem:[#allocation2 + $0x30] sm:$0xff] %v854_v41  ;;  %v1324_v50 = vmul.f32 %v2051_v28, %v1323_v44  ;;  %vm1327_vm11 = vweird.f32 %v2051_v28  ;;  %v1337_v51 = vmul.f32 %v2053_v40, %v2773_v55  ;;  %vm1341_vm12 = vweird.f32 %v2773_v55  ;;  %v420_v39 = vpop.f32.mrf.mxu1 }
 0x107   :  { %v864_v53 = vsel %vm863_vm10, %v2049_v17, %v860_v49  ;;  %v1345_v54 = vand.u32 2147483647, %v2773_v55  ;;  %2058 = vpow2.f32 %v2742_v33  ;;  %v1900_v56 = vmul.f32 -1.442695, %v414_v42  ;;  %vm1328_vm13 = vmor %vm1326_vm5, %vm1327_vm11  ;;  %v352_v23 = vpop.f32.mrf.mxu2 }
 0x108   :  { %v2055_v30 = vpop.eup %2054  ;;  %v869_v58 = vsel %vm2818_vm6, %v868_v37, %v864_v53  ;;  %v1325_v48 = vadd.f32 %v2051_v28, %v1324_v50  ;;  %v1338_v60 = vsub.f32 1.0, %v1337_v51  ;;  %2060 = vpow2.f32 %v2744_v34 }
 0x109   :  { %1718 = vst [vmem:[#allocation2 + $0x38] sm:$0xff] %v869_v58  ;;  %v1348_v61 = vor.u32 1.1754944e-38, %v1347_v47  ;;  %v872_v62 = vmul.f32 %v2055_v30, %v2776_v59  ;;  %2062 = vpow2.f32 %v1899_v38  ;;  %v1931_v33 = vmul.f32 -1.442695, %v349_v52 }
 0x10a   :  { %v1329_v1 = vsel %vm1328_vm13, %v2051_v28, %v1325_v48  ;;  %v1339_v2 = vmul.f32 %v2053_v40, %v1338_v60  ;;  %vm1342_vm14 = vweird.f32 %v2053_v40  ;;  %v882_v3 = vand.u32 2147483648, %v2776_v59 }
 0x10b   :  { %v2057_v4 = vpop.eup %2056  ;;  %v1334_v34 = vsel %vm2826_vm9, %v1333_v46, %v1329_v1  ;;  %v873_v63 = vsub.f32 1.0, %v872_v62  ;;  %vm876_vm15 = vweird.f32 %v2776_v59  ;;  %v1932_v45 = vmul.f32 -1.442695, %v462_v57  ;;  %vm1343_vm0 = vmor %vm1341_vm12, %vm1342_vm14 }
 0x10c   :  { %1749 = vst [vmem:[#allocation2 + $0x130] sm:$0xff] %v1334_v34  ;;  %v1340_v5 = vadd.f32 %v2053_v40, %v1339_v2  ;;  %v2851_v6 = vadd.f32 1.0, %v2057_v4  ;;  %2064 = vpow2.f32 %v1900_v56  ;;  %v1901_v7 = vmul.f32 -1.442695, %v304_v0 }
 0x10d   :  { %v2059_v8 = vpop.eup %2058  ;;  %v874_v9 = vmul.f32 %v2055_v30, %v873_v63  ;;  %vm877_vm1 = vweird.f32 %v2055_v30  ;;  %v880_v11 = vand.u32 2147483647, %v2776_v59  ;;  %2066 = vpow2.f32 %v1931_v33 }
 0x10e   :  { %v2061_v12 = vpop.eup %2060  ;;  %v1344_v15 = vsel %vm1343_vm0, %v2053_v40, %v1340_v5  ;;  %vm1346_vm2 = vcmp.eq.f32.partialorder %v1345_v54, 8.507059e+37  ;;  %v883_v16 = vor.u32 1.1754944e-38, %v882_v3  ;;  %2068 = vrcp.f32 %v2851_v6  ;;  %vm878_vm3 = vmor %vm876_vm15, %vm877_vm1 }
 0x10f   :  { %v2063_v17 = vpop.eup %2062  ;;  %v1349_v13 = vsel %vm1346_vm2, %v1348_v61, %v1344_v15  ;;  %v875_v18 = vadd.f32 %v2055_v30, %v874_v9  ;;  %v2857_v19 = vadd.f32 1.0, %v2059_v8  ;;  %2070 = vpow2.f32 %v1932_v45 }
 0x110   :  { %1750 = vst [vmem:[#allocation2 + $0x138] sm:$0xff] %v1349_v13  ;;  %v2862_v55 = vadd.f32 1.0, %v2061_v12  ;;  %v2864_v20 = vadd.f32 1.0, %v2063_v17  ;;  %2072 = vpow2.f32 %v1901_v7  ;;  %v1902_v21 = vmul.f32 -1.442695, %v417_v10 }
 0x111   :  { %v879_v24 = vsel %vm878_vm3, %v2055_v30, %v875_v18  ;;  %vm881_vm4 = vcmp.eq.f32.partialorder %v880_v11, 8.507059e+37  ;;  %v895_v25 = vand.u32 2147483647, %v2851_v6  ;;  %2074 = vrcp.f32 %v2857_v19 }
 0x112   :  { %v2065_v27 = vpop.eup %2064  ;;  %v884_v14 = vsel %vm881_vm4, %v883_v16, %v879_v24  ;;  %v897_v28 = vand.u32 2147483648, %v2851_v6  ;;  %2076 = vrcp.f32 %v2862_v55  ;;  %v1362_v29 = vand.u32 2147483648, %v2857_v19 }
 0x113   :  { %v2067_v59 = vpop.eup %2066  ;;  %1719 = vst [vmem:[#allocation2 + $0x40] sm:$0xff] %v884_v14  ;;  %2078 = vrcp.f32 %v2864_v20  ;;  %v2872_v31 = vmul.f32 -1.442695, %v352_v23  ;;  %vm891_vm5 = vweird.f32 %v2851_v6  ;;  %v1360_v32 = vand.u32 2147483647, %v2857_v19 }
 0x114   :  { %v2069_v26 = vpop.eup %2068  ;;  %2080 = vpow2.f32 %v1902_v21  ;;  %v2876_v35 = vmul.f32 -1.442695, %v465_v22  ;;  %vm2879_vm6 = vcmp.eq.f32.partialorder %v895_v25, 8.507059e+37  ;;  %v1375_v42 = vand.u32 2147483647, %v2862_v55 }
 0x115   :  { %v2071_v36 = vpop.eup %2070  ;;  %v887_v37 = vmul.f32 %v2069_v26, %v2851_v6  ;;  %v1377_v43 = vand.u32 2147483648, %v2862_v55  ;;  %v898_v46 = vor.u32 1.1754944e-38, %v897_v28  ;;  %vm1356_vm7 = vweird.f32 %v2857_v19  ;;  %v307_v28 = vpop.f32.mrf.mxu0 }
 0x116   :  { %v2073_v44 = vpop.eup %2072  ;;  %v910_v47 = vand.u32 2147483647, %v2864_v20  ;;  %v2887_v40 = vadd.f32 1.0, %v2065_v27  ;;  %v1363_v38 = vor.u32 1.1754944e-38, %v1362_v29  ;;  %vm1371_vm8 = vweird.f32 %v2862_v55 }
 0x117   :  { %v2075_v41 = vpop.eup %2074  ;;  %v888_v49 = vsub.f32 1.0, %v887_v37  ;;  %v2890_v50 = vadd.f32 1.0, %v2067_v59  ;;  %vm892_vm9 = vweird.f32 %v2069_v26  ;;  %vm2893_vm10 = vcmp.eq.f32.partialorder %v1360_v32, 8.507059e+37 }
 0x118   :  { %v2077_v51 = vpop.eup %2076  ;;  %v1352_v52 = vmul.f32 %v2075_v41, %v2857_v19  ;;  %vm906_vm11 = vweird.f32 %v2864_v20  ;;  %2082 = vrcp.f32 %v2887_v40  ;;  %vm2900_vm12 = vcmp.eq.f32.partialorder %v1375_v42, 8.507059e+37  ;;  %vm893_vm14 = vmor %vm891_vm5, %vm892_vm9 }
 0x119   :  { %v2079_v54 = vpop.eup %2078  ;;  %v889_v56 = vmul.f32 %v2069_v26, %v888_v49  ;;  %v1367_v57 = vmul.f32 %v2077_v51, %v2862_v55  ;;  %v1378_v58 = vor.u32 1.1754944e-38, %v1377_v43  ;;  %vm2905_vm13 = vcmp.eq.f32.partialorder %v910_v47, 8.507059e+37 }
 0x11a   :  { %v2081_v48 = vpop.eup %2080  ;;  %v1353_v60 = vsub.f32 1.0, %v1352_v52  ;;  %v902_v61 = vmul.f32 %v2079_v54, %v2864_v20  ;;  %v912_v33 = vand.u32 2147483648, %v2864_v20  ;;  %2084 = vrcp.f32 %v2890_v50 }
 0x11b   :  { %v890_v0 = vadd.f32 %v2069_v26, %v889_v56  ;;  %v1368_v1 = vsub.f32 1.0, %v1367_v57  ;;  %v2911_v2 = vadd.f32 1.0, %v2071_v36  ;;  %vm1357_vm15 = vweird.f32 %v2075_v41 }
 0x11c   :  { %v1354_v3 = vmul.f32 %v2075_v41, %v1353_v60  ;;  %v903_v4 = vsub.f32 1.0, %v902_v61  ;;  %v2916_v34 = vadd.f32 1.0, %v2073_v44  ;;  %vm1372_vm0 = vweird.f32 %v2077_v51  ;;  %vm1358_vm2 = vmor %vm1356_vm7, %vm1357_vm15 }
 0x11d   :  { %v894_v63 = vsel %vm893_vm14, %v2069_v26, %v890_v0  ;;  %v1369_v45 = vmul.f32 %v2077_v51, %v1368_v1  ;;  %v2918_v5 = vadd.f32 1.0, %v2081_v48  ;;  %vm907_vm1 = vweird.f32 %v2079_v54  ;;  %vm1373_vm3 = vmor %vm1371_vm8, %vm1372_vm0  ;;  %v468_v48 = vpop.f32.mrf.mxu3 }
 0x11e   :  { %v2083_v7 = vpop.eup %2082  ;;  %v899_v8 = vsel %vm2879_vm6, %v898_v46, %v894_v63  ;;  %v1355_v9 = vadd.f32 %v2075_v41, %v1354_v3  ;;  %v904_v11 = vmul.f32 %v2079_v54, %v903_v4  ;;  %v913_v10 = vor.u32 1.1754944e-38, %v912_v33  ;;  %vm908_vm4 = vmor %vm906_vm11, %vm907_vm1  ;;  %v310_v4 = vpop.f32.mrf.mxu0 }
 0x11f   :  { %1720 = vst [vmem:[#allocation2 + $0x48] sm:$0xff] %v899_v8  ;;  %v1370_v6 = vadd.f32 %v2077_v51, %v1369_v45  ;;  %v917_v12 = vmul.f32 %v2083_v7, %v2887_v40  ;;  %v925_v15 = vand.u32 2147483647, %v2887_v40  ;;  %v927_v13 = vand.u32 2147483648, %v2887_v40 }
 0x120   :  { %v1359_v16 = vsel %vm1358_vm2, %v2075_v41, %v1355_v9  ;;  %v905_v17 = vadd.f32 %v2079_v54, %v904_v11  ;;  %2086 = vrcp.f32 %v2911_v2  ;;  %v2085_v18 = vpop.eup %2084  ;;  %v1390_v24 = vand.u32 2147483647, %v2890_v50 }
 0x121   :  { %v1364_v19 = vsel %vm2893_vm10, %v1363_v38, %v1359_v16  ;;  %v1374_v21 = vsel %vm1373_vm3, %v2077_v51, %v1370_v6  ;;  %v918_v23 = vsub.f32 1.0, %v917_v12  ;;  %vm921_vm5 = vweird.f32 %v2887_v40  ;;  %v423_v6 = vpop.f32.mrf.mxu1 }
 0x122   :  { %1751 = vst [vmem:[#allocation2 + $0x140] sm:$0xff] %v1364_v19  ;;  %v1379_v55 = vsel %vm2900_vm12, %v1378_v58, %v1374_v21  ;;  %v909_v25 = vsel %vm908_vm4, %v2079_v54, %v905_v17  ;;  %v1382_v22 = vmul.f32 %v2085_v18, %v2890_v50  ;;  %vm922_vm6 = vweird.f32 %v2083_v7  ;;  %v355_v54 = vpop.f32.mrf.mxu2 }
 0x123   :  { %1752 = vst [vmem:[#allocation2 + $0x148] sm:$0xff] %v1379_v55  ;;  %v914_v27 = vsel %vm2905_vm13, %v913_v10, %v909_v25  ;;  %v919_v14 = vmul.f32 %v2083_v7, %v918_v23  ;;  %v1392_v20 = vand.u32 2147483648, %v2890_v50  ;;  %vm2943_vm7 = vcmp.eq.f32.partialorder %v925_v15, 8.507059e+37  ;;  %vm923_vm10 = vmor %vm921_vm5, %vm922_vm6 }
 0x124   :  { %1721 = vst [vmem:[#allocation2 + $0x50] sm:$0xff] %v914_v27  ;;  %v1383_v29 = vsub.f32 1.0, %v1382_v22  ;;  %vm1386_vm8 = vweird.f32 %v2890_v50  ;;  %2088 = vrcp.f32 %v2916_v34  ;;  %v928_v32 = vor.u32 1.1754944e-38, %v927_v13 }
 0x125   :  { %v920_v26 = vadd.f32 %v2083_v7, %v919_v14  ;;  %vm2949_vm9 = vcmp.eq.f32.partialorder %v1390_v24, 8.507059e+37  ;;  %v1405_v37 = vand.u32 2147483647, %v2911_v2  ;;  %vm1387_vm11 = vweird.f32 %v2085_v18 }
 0x126   :  { %v2087_v42 = vpop.eup %2086  ;;  %v1384_v43 = vmul.f32 %v2085_v18, %v1383_v29  ;;  %v1407_v44 = vand.u32 2147483648, %v2911_v2  ;;  %2090 = vrcp.f32 %v2918_v5  ;;  %v1393_v47 = vor.u32 1.1754944e-38, %v1392_v20  ;;  %vm1388_vm14 = vmor %vm1386_vm8, %vm1387_vm11  ;;  %v471_v29 = vpop.f32.mrf.mxu3 }
 0x127   :  { %v924_v46 = vsel %vm923_vm10, %v2083_v7, %v920_v26  ;;  %v1397_v41 = vmul.f32 %v2087_v42, %v2911_v2  ;;  %vm1401_vm12 = vweird.f32 %v2911_v2  ;;  %vm936_vm13 = vweird.f32 %v2916_v34 }
 0x128   :  { %v929_v49 = vsel %vm2943_vm7, %v928_v32, %v924_v46  ;;  %v1385_v38 = vadd.f32 %v2085_v18, %v1384_v43  ;;  %v940_v40 = vand.u32 2147483647, %v2916_v34  ;;  %vm2966_vm15 = vcmp.eq.f32.partialorder %v1405_v37, 8.507059e+37 }
 0x129   :  { %1722 = vst [vmem:[#allocation2 + $0x58] sm:$0xff] %v929_v49  ;;  %v1398_v51 = vsub.f32 1.0, %v1397_v41  ;;  %2092 = vpow2.f32 %v2872_v31  ;;  %v1903_v53 = vmul.f32 -1.442695, %v307_v28  ;;  %v1408_v30 = vor.u32 1.1754944e-38, %v1407_v44 }
 0x12a   :  { %v2089_v56 = vpop.eup %2088  ;;  %v1389_v57 = vsel %vm1388_vm14, %v2085_v18, %v1385_v38  ;;  %2094 = vpow2.f32 %v2876_v35  ;;  %v1904_v58 = vmul.f32 -1.442695, %v420_v39  ;;  %vm1402_vm0 = vweird.f32 %v2087_v42 }
 0x12b   :  { %v1394_v50 = vsel %vm2949_vm9, %v1393_v47, %v1389_v57  ;;  %v1399_v60 = vmul.f32 %v2087_v42, %v1398_v51  ;;  %v932_v61 = vmul.f32 %v2089_v56, %v2916_v34  ;;  %v942_v31 = vand.u32 2147483648, %v2916_v34  ;;  %vm1403_vm2 = vmor %vm1401_vm12, %vm1402_vm0  ;;  %v358_v34 = vpop.f32.mrf.mxu2 }
 0x12c   :  { %v2091_v62 = vpop.eup %2090  ;;  %1753 = vst [vmem:[#allocation2 + $0x150] sm:$0xff] %v1394_v50  ;;  %vm951_vm1 = vweird.f32 %v2918_v5  ;;  %2096 = vpow2.f32 %v1903_v53  ;;  %v1935_v33 = vmul.f32 -1.442695, %v355_v54  ;;  %v1936_v3 = vmul.f32 -1.442695, %v468_v48 }
 0x12d   :  { %v1400_v0 = vadd.f32 %v2087_v42, %v1399_v60  ;;  %v933_v1 = vsub.f32 1.0, %v932_v61  ;;  %v947_v35 = vmul.f32 %v2091_v62, %v2918_v5  ;;  %vm937_vm3 = vweird.f32 %v2089_v56 }
 0x12e   :  { %v955_v63 = vand.u32 2147483647, %v2918_v5  ;;  %v957_v45 = vand.u32 2147483648, %v2918_v5  ;;  %2098 = vpow2.f32 %v1904_v58  ;;  %vm952_vm4 = vweird.f32 %v2091_v62  ;;  %vm938_vm5 = vmor %vm936_vm13, %vm937_vm3 }
 0x12f   :  { %v2093_v7 = vpop.eup %2092  ;;  %v1404_v8 = vsel %vm1403_vm2, %v2087_v42, %v1400_v0  ;;  %v934_v9 = vmul.f32 %v2089_v56, %v933_v1  ;;  %v948_v11 = vsub.f32 1.0, %v947_v35  ;;  %2100 = vpow2.f32 %v1935_v33  ;;  %vm953_vm7 = vmor %vm951_vm1, %vm952_vm4  ;;  %v474_v0 = vpop.f32.mrf.mxu3 }
 0x130   :  { %v2095_v10 = vpop.eup %2094  ;;  %v1409_v12 = vsel %vm2966_vm15, %v1408_v30, %v1404_v8  ;;  %v2984_v15 = vadd.f32 1.0, %v2093_v7  ;;  %v1905_v2 = vmul.f32 -1.442695, %v310_v4  ;;  %2102 = vpow2.f32 %v1936_v3 }
 0x131   :  { %1754 = vst [vmem:[#allocation2 + $0x158] sm:$0xff] %v1409_v12  ;;  %v935_v16 = vadd.f32 %v2089_v56, %v934_v9  ;;  %v949_v17 = vmul.f32 %v2091_v62, %v948_v11  ;;  %v2986_v13 = vadd.f32 1.0, %v2095_v10  ;;  %v943_v19 = vor.u32 1.1754944e-38, %v942_v31 }
 0x132   :  { %v2097_v18 = vpop.eup %2096  ;;  %2104 = vrcp.f32 %v2984_v15  ;;  %v1906_v21 = vmul.f32 -1.442695, %v423_v6  ;;  %vm941_vm6 = vcmp.eq.f32.partialorder %v940_v40, 8.507059e+37  ;;  %vm956_vm8 = vcmp.eq.f32.partialorder %v955_v63, 8.507059e+37 }
 0x133   :  { %v939_v23 = vsel %vm938_vm5, %v2089_v56, %v935_v16  ;;  %v950_v24 = vadd.f32 %v2091_v62, %v949_v17  ;;  %2106 = vrcp.f32 %v2986_v13  ;;  %v958_v22 = vor.u32 1.1754944e-38, %v957_v45 }
 0x134   :  { %v2099_v55 = vpop.eup %2098  ;;  %v944_v25 = vsel %vm941_vm6, %v943_v19, %v939_v23  ;;  %2108 = vpow2.f32 %v1905_v2  ;;  %v1420_v20 = vand.u32 2147483647, %v2984_v15  ;;  %v2997_v28 = vadd.f32 1.0, %v2097_v18 }
 0x135   :  { %v2101_v27 = vpop.eup %2100  ;;  %1723 = vst [vmem:[#allocation2 + $0x60] sm:$0xff] %v944_v25  ;;  %v954_v14 = vsel %vm953_vm7, %v2091_v62, %v950_v24  ;;  %v2999_v59 = vadd.f32 1.0, %v2099_v55  ;;  %v1422_v32 = vand.u32 2147483648, %v2984_v15  ;;  %2110 = vpow2.f32 %v1906_v21 }
 0x136   :  { %v959_v26 = vsel %vm956_vm8, %v958_v22, %v954_v14  ;;  %v2103_v5 = vpop.eup %2102  ;;  %2112 = vrcp.f32 %v2997_v28  ;;  %v3003_v36 = vadd.f32 1.0, %v2101_v27  ;;  %v1937_v37 = vmul.f32 -1.442695, %v358_v34 }
 0x137   :  { %1724 = vst [vmem:[#allocation2 + $0x68] sm:$0xff] %v959_v26  ;;  %v1435_v42 = vand.u32 2147483647, %v2986_v13  ;;  %v1437_v43 = vand.u32 2147483648, %v2986_v13  ;;  %2114 = vrcp.f32 %v2999_v59  ;;  %v3008_v44 = vmul.f32 -1.442695, %v471_v29 }
 0x138   :  { %v2105_v39 = vpop.eup %2104  ;;  %vm1416_vm9 = vweird.f32 %v2984_v15  ;;  %vm3012_vm10 = vcmp.eq.f32.partialorder %v1420_v20, 8.507059e+37  ;;  %vm1431_vm11 = vweird.f32 %v2986_v13  ;;  %v1423_v38 = vor.u32 1.1754944e-38, %v1422_v32  ;;  %v313_v32 = vpop.f32.mrf.mxu0 }
 0x139   :  { %v2107_v46 = vpop.eup %2106  ;;  %v1412_v47 = vmul.f32 %v2105_v39, %v2984_v15  ;;  %v970_v51 = vand.u32 2147483647, %v2997_v28  ;;  %v972_v52 = vand.u32 2147483648, %v2997_v28  ;;  %v985_v54 = vand.u32 2147483647, %v2999_v59 }
 0x13a   :  { %v2109_v49 = vpop.eup %2108  ;;  %v1427_v40 = vmul.f32 %v2107_v46, %v2986_v13  ;;  %v987_v56 = vand.u32 2147483648, %v2999_v59  ;;  %2116 = vrcp.f32 %v3003_v36  ;;  %vm3023_vm12 = vcmp.eq.f32.partialorder %v1435_v42, 8.507059e+37 }
 0x13b   :  { %v1413_v53 = vsub.f32 1.0, %v1412_v47  ;;  %v2111_v57 = vpop.eup %2110  ;;  %v1438_v48 = vor.u32 1.1754944e-38, %v1437_v43  ;;  %v3027_v50 = vadd.f32 1.0, %v2103_v5  ;;  %vm1417_vm13 = vweird.f32 %v2105_v39 }
 0x13c   :  { %v1428_v30 = vsub.f32 1.0, %v1427_v40  ;;  %v2113_v60 = vpop.eup %2112  ;;  %vm966_vm14 = vweird.f32 %v2997_v28  ;;  %vm981_vm15 = vweird.f32 %v2999_v59  ;;  %vm1432_vm0 = vweird.f32 %v2107_v46  ;;  %vm1418_vm3 = vmor %vm1416_vm9, %vm1417_vm13 }
 0x13d   :  { %v1414_v61 = vmul.f32 %v2105_v39, %v1413_v53  ;;  %v2115_v62 = vpop.eup %2114  ;;  %v962_v33 = vmul.f32 %v2113_v60, %v2997_v28  ;;  %vm3032_vm1 = vcmp.eq.f32.partialorder %v970_v51, 8.507059e+37  ;;  %v973_v1 = vor.u32 1.1754944e-38, %v972_v52  ;;  %vm1433_vm4 = vmor %vm1431_vm11, %vm1432_vm0  ;;  %v361_v53 = vpop.f32.mrf.mxu2 }
 0x13e   :  { %v1429_v31 = vmul.f32 %v2107_v46, %v1428_v30  ;;  %v977_v3 = vmul.f32 %v2115_v62, %v2999_v59  ;;  %vm3037_vm2 = vcmp.eq.f32.partialorder %v985_v54, 8.507059e+37  ;;  %v988_v63 = vor.u32 1.1754944e-38, %v987_v56 }
 0x13f   :  { %v1415_v35 = vadd.f32 %v2105_v39, %v1414_v61  ;;  %2118 = vpow2.f32 %v1937_v37  ;;  %v963_v7 = vsub.f32 1.0, %v962_v33  ;;  %v3044_v8 = vadd.f32 1.0, %v2109_v49 }
 0x140   :  { %v1430_v45 = vadd.f32 %v2107_v46, %v1429_v31  ;;  %2120 = vrcp.f32 %v3027_v50  ;;  %v2117_v9 = vpop.eup %2116  ;;  %vm967_vm5 = vweird.f32 %v2113_v60  ;;  %v978_v6 = vsub.f32 1.0, %v977_v3 }
 0x141   :  { %v1419_v11 = vsel %vm1418_vm3, %v2105_v39, %v1415_v35  ;;  %v3049_v10 = vadd.f32 1.0, %v2111_v57  ;;  %v964_v2 = vmul.f32 %v2113_v60, %v963_v7  ;;  %v1442_v16 = vmul.f32 %v2117_v9, %v3003_v36  ;;  %vm968_vm7 = vmor %vm966_vm14, %vm967_vm5  ;;  %v426_v39 = vpop.f32.mrf.mxu1 }
 0x142   :  { %v1424_v12 = vsel %vm3012_vm10, %v1423_v38, %v1419_v11  ;;  %v1434_v15 = vsel %vm1433_vm4, %v2107_v46, %v1430_v45  ;;  %v979_v18 = vmul.f32 %v2115_v62, %v978_v6  ;;  %vm982_vm6 = vweird.f32 %v2115_v62 }
 0x143   :  { %1755 = vst [vmem:[#allocation2 + $0x160] sm:$0xff] %v1424_v12  ;;  %v1439_v17 = vsel %vm3023_vm12, %v1438_v48, %v1434_v15  ;;  %v1450_v13 = vand.u32 2147483647, %v3003_v36  ;;  %v965_v19 = vadd.f32 %v2113_v60, %v964_v2  ;;  %v1443_v21 = vsub.f32 1.0, %v1442_v16  ;;  %vm983_vm9 = vmor %vm981_vm15, %vm982_vm6  ;;  %v316_v2 = vpop.f32.mrf.mxu0 }
 0x144   :  { %1756 = vst [vmem:[#allocation2 + $0x168] sm:$0xff] %v1439_v17  ;;  %v1452_v23 = vand.u32 2147483648, %v3003_v36  ;;  %2122 = vrcp.f32 %v3044_v8  ;;  %v980_v55 = vadd.f32 %v2115_v62, %v979_v18  ;;  %vm1446_vm8 = vweird.f32 %v3003_v36 }
 0x145   :  { %v2119_v24 = vpop.eup %2118  ;;  %v1465_v25 = vand.u32 2147483647, %v3027_v50  ;;  %v1467_v22 = vand.u32 2147483648, %v3027_v50  ;;  %v969_v27 = vsel %vm968_vm7, %v2113_v60, %v965_v19  ;;  %v1444_v14 = vmul.f32 %v2117_v9, %v1443_v21 }
 0x146   :  { %v2121_v34 = vpop.eup %2120  ;;  %vm1447_vm10 = vweird.f32 %v2117_v9  ;;  %2124 = vrcp.f32 %v3049_v10  ;;  %v974_v20 = vsel %vm3032_vm1, %v973_v1, %v969_v27  ;;  %v984_v28 = vsel %vm983_vm9, %v2115_v62, %v980_v55 }
 0x147   :  { %vm3071_vm11 = vcmp.eq.f32.partialorder %v1450_v13, 8.507059e+37  ;;  %v1457_v26 = vmul.f32 %v2121_v34, %v3027_v50  ;;  %1725 = vst [vmem:[#allocation2 + $0x70] sm:$0xff] %v974_v20  ;;  %v989_v59 = vsel %vm3037_vm2, %v988_v63, %v984_v28  ;;  %v1445_v5 = vadd.f32 %v2117_v9, %v1444_v14  ;;  %vm1448_vm13 = vmor %vm1446_vm8, %vm1447_vm10 }
 0x148   :  { %v1453_v37 = vor.u32 1.1754944e-38, %v1452_v23  ;;  %vm1461_vm12 = vweird.f32 %v3027_v50  ;;  %1726 = vst [vmem:[#allocation2 + $0x78] sm:$0xff] %v989_v59  ;;  %vm3081_vm14 = vcmp.eq.f32.partialorder %v1465_v25, 8.507059e+37  ;;  %v1468_v46 = vor.u32 1.1754944e-38, %v1467_v22 }
 0x149   :  { %v1458_v42 = vsub.f32 1.0, %v1457_v26  ;;  %v3085_v47 = vadd.f32 1.0, %v2119_v24  ;;  %v1449_v49 = vsel %vm1448_vm13, %v2117_v9, %v1445_v5  ;;  %vm1462_vm15 = vweird.f32 %v2121_v34  ;;  %v429_v22 = vpop.f32.mrf.mxu1 }
 0x14a   :  { %v2123_v41 = vpop.eup %2122  ;;  %2126 = vpow2.f32 %v3008_v44  ;;  %v1907_v38 = vmul.f32 -1.442695, %v313_v32  ;;  %v1454_v40 = vsel %vm3071_vm11, %v1453_v37, %v1449_v49  ;;  %v1908_v52 = vmul.f32 -1.442695, %v426_v39  ;;  %vm1463_vm1 = vmor %vm1461_vm12, %vm1462_vm15 }
 0x14b   :  { %v1459_v51 = vmul.f32 %v2121_v34, %v1458_v42  ;;  %v992_v36 = vmul.f32 %v2123_v41, %v3044_v8  ;;  %1757 = vst [vmem:[#allocation2 + $0x170] sm:$0xff] %v1454_v40  ;;  %vm996_vm0 = vweird.f32 %v3044_v8  ;;  %v1000_v56 = vand.u32 2147483647, %v3044_v8 }
 0x14c   :  { %v2125_v54 = vpop.eup %2124  ;;  %v1002_v57 = vand.u32 2147483648, %v3044_v8  ;;  %2128 = vrcp.f32 %v3085_v47  ;;  %v1015_v48 = vand.u32 2147483647, %v3049_v10  ;;  %vm997_vm2 = vweird.f32 %v2123_v41 }
 0x14d   :  { %v1460_v44 = vadd.f32 %v2121_v34, %v1459_v51  ;;  %v993_v30 = vsub.f32 1.0, %v992_v36  ;;  %v1007_v58 = vmul.f32 %v2125_v54, %v3049_v10  ;;  %v1017_v60 = vand.u32 2147483648, %v3049_v10  ;;  %vm998_vm5 = vmor %vm996_vm0, %vm997_vm2 }
 0x14e   :  { %2130 = vpow2.f32 %v1907_v38  ;;  %v1939_v61 = vmul.f32 -1.442695, %v361_v53  ;;  %vm1011_vm3 = vweird.f32 %v3049_v10  ;;  %vm1012_vm4 = vweird.f32 %v2125_v54  ;;  %v477_v38 = vpop.f32.mrf.mxu3 }
 0x14f   :  { %v1464_v62 = vsel %vm1463_vm1, %v2121_v34, %v1460_v44  ;;  %v994_v31 = vmul.f32 %v2123_v41, %v993_v30  ;;  %v1008_v33 = vsub.f32 1.0, %v1007_v58  ;;  %2132 = vpow2.f32 %v1908_v52  ;;  %vm1013_vm8 = vmor %vm1011_vm3, %vm1012_vm4  ;;  %v364_v34 = vpop.f32.mrf.mxu2 }
 0x150   :  { %v2127_v1 = vpop.eup %2126  ;;  %v1469_v35 = vsel %vm3081_vm14, %v1468_v46, %v1464_v62  ;;  %2134 = vpow2.f32 %v1939_v61  ;;  %vm1001_vm6 = vcmp.eq.f32.partialorder %v1000_v56, 8.507059e+37  ;;  %v1003_v45 = vor.u32 1.1754944e-38, %v1002_v57 }
 0x151   :  { %1758 = vst [vmem:[#allocation2 + $0x178] sm:$0xff] %v1469_v35  ;;  %v995_v50 = vadd.f32 %v2123_v41, %v994_v31  ;;  %v1009_v3 = vmul.f32 %v2125_v54, %v1008_v33  ;;  %v3104_v4 = vadd.f32 1.0, %v2127_v1  ;;  %vm3109_vm7 = vcmp.eq.f32.partialorder %v1015_v48, 8.507059e+37 }
 0x152   :  { %v2129_v63 = vpop.eup %2128  ;;  %v1940_v9 = vmul.f32 -1.442695, %v474_v0  ;;  %v1018_v12 = vor.u32 1.1754944e-38, %v1017_v60  ;;  %v1480_v8 = vand.u32 2147483647, %v3085_v47  ;;  %v1482_v18 = vand.u32 2147483648, %v3085_v47 }
 0x153   :  { %v999_v11 = vsel %vm998_vm5, %v2123_v41, %v995_v50  ;;  %v1010_v6 = vadd.f32 %v2125_v54, %v1009_v3  ;;  %v1472_v15 = vmul.f32 %v2129_v63, %v3085_v47  ;;  %2136 = vrcp.f32 %v3104_v4  ;;  %v319_v3 = vpop.f32.mrf.mxu0 }
 0x154   :  { %v2131_v16 = vpop.eup %2130  ;;  %v1004_v17 = vsel %vm1001_vm6, %v1003_v45, %v999_v11  ;;  %vm1476_vm9 = vweird.f32 %v3085_v47  ;;  %2138 = vpow2.f32 %v1940_v9  ;;  %v1909_v25 = vmul.f32 -1.442695, %v316_v2 }
 0x155   :  { %v2133_v13 = vpop.eup %2132  ;;  %1727 = vst [vmem:[#allocation2 + $0x80] sm:$0xff] %v1004_v17  ;;  %v1014_v19 = vsel %vm1013_vm8, %v2125_v54, %v1010_v6  ;;  %v1473_v21 = vsub.f32 1.0, %v1472_v15  ;;  %v3121_v23 = vadd.f32 1.0, %v2131_v16  ;;  %vm1477_vm10 = vweird.f32 %v2129_v63 }
 0x156   :  { %v2135_v24 = vpop.eup %2134  ;;  %v1019_v55 = vsel %vm3109_vm7, %v1018_v12, %v1014_v19  ;;  %v3125_v10 = vadd.f32 1.0, %v2133_v13  ;;  %v1495_v14 = vand.u32 2147483647, %v3104_v4  ;;  %vm3129_vm11 = vcmp.eq.f32.partialorder %v1480_v8, 8.507059e+37  ;;  %vm1478_vm12 = vmor %vm1476_vm9, %vm1477_vm10  ;;  %v432_v13 = vpop.f32.mrf.mxu1 }
 0x157   :  { %1728 = vst [vmem:[#allocation2 + $0x88] sm:$0xff] %v1019_v55  ;;  %v1474_v27 = vmul.f32 %v2129_v63, %v1473_v21  ;;  %2140 = vrcp.f32 %v3121_v23  ;;  %v1483_v28 = vor.u32 1.1754944e-38, %v1482_v18  ;;  %v1497_v29 = vand.u32 2147483648, %v3104_v4 }
 0x158   :  { %2142 = vrcp.f32 %v3125_v10  ;;  %v3135_v32 = vadd.f32 1.0, %v2135_v24  ;;  %v1910_v59 = vmul.f32 -1.442695, %v429_v22  ;;  %v1941_v5 = vmul.f32 -1.442695, %v364_v34 }
 0x159   :  { %v1475_v26 = vadd.f32 %v2129_v63, %v1474_v27  ;;  %v2137_v37 = vpop.eup %2136  ;;  %vm1491_vm13 = vweird.f32 %v3104_v4  ;;  %v1030_v39 = vand.u32 2147483647, %v3121_v23  ;;  %v1032_v42 = vand.u32 2147483648, %v3121_v23 }
 0x15a   :  { %2144 = vpow2.f32 %v1909_v25  ;;  %v1487_v46 = vmul.f32 %v2137_v37, %v3104_v4  ;;  %vm3143_vm14 = vcmp.eq.f32.partialorder %v1495_v14, 8.507059e+37  ;;  %v1045_v49 = vand.u32 2147483647, %v3125_v10  ;;  %v2139_v40 = vpop.eup %2138 }
 0x15b   :  { %v1479_v43 = vsel %vm1478_vm12, %v2129_v63, %v1475_v26  ;;  %v1498_v51 = vor.u32 1.1754944e-38, %v1497_v29  ;;  %v1047_v36 = vand.u32 2147483648, %v3125_v10  ;;  %2146 = vrcp.f32 %v3135_v32 }
 0x15c   :  { %v1484_v47 = vsel %vm3129_vm11, %v1483_v28, %v1479_v43  ;;  %v1488_v53 = vsub.f32 1.0, %v1487_v46  ;;  %vm1026_vm15 = vweird.f32 %v3121_v23  ;;  %vm1041_vm0 = vweird.f32 %v3125_v10  ;;  %v367_v28 = vpop.f32.mrf.mxu2 }
 0x15d   :  { %v2141_v52 = vpop.eup %2140  ;;  %1759 = vst [vmem:[#allocation2 + $0x180] sm:$0xff] %v1484_v47  ;;  %v3154_v54 = vadd.f32 1.0, %v2139_v40  ;;  %vm3157_vm1 = vcmp.eq.f32.partialorder %v1030_v39, 8.507059e+37  ;;  %v1033_v30 = vor.u32 1.1754944e-38, %v1032_v42  ;;  %2148 = vpow2.f32 %v1910_v59  ;;  %v480_v40 = vpop.f32.mrf.mxu3 }
 0x15e   :  { %v2143_v56 = vpop.eup %2142  ;;  %v1022_v57 = vmul.f32 %v2141_v52, %v3121_v23  ;;  %v1942_v58 = vmul.f32 -1.442695, %v477_v38  ;;  %v1489_v48 = vmul.f32 %v2137_v37, %v1488_v53  ;;  %vm1492_vm2 = vweird.f32 %v2137_v37 }
 0x15f   :  { %v1037_v60 = vmul.f32 %v2143_v56, %v3125_v10  ;;  %vm3162_vm3 = vcmp.eq.f32.partialorder %v1045_v49, 8.507059e+37  ;;  %v1048_v33 = vor.u32 1.1754944e-38, %v1047_v36  ;;  %v1510_v0 = vand.u32 2147483647, %v3135_v32  ;;  %vm1493_vm5 = vmor %vm1491_vm13, %vm1492_vm2 }
 0x160   :  { %v2145_v62 = vpop.eup %2144  ;;  %v1023_v31 = vsub.f32 1.0, %v1022_v57  ;;  %2150 = vrcp.f32 %v3154_v54  ;;  %v1490_v1 = vadd.f32 %v2137_v37, %v1489_v48  ;;  %vm1506_vm4 = vweird.f32 %v3135_v32 }
 0x161   :  { %v1038_v35 = vsub.f32 1.0, %v1037_v60  ;;  %v1512_v50 = vand.u32 2147483648, %v3135_v32  ;;  %v2147_v63 = vpop.eup %2146  ;;  %vm1027_vm6 = vweird.f32 %v2141_v52  ;;  %v3172_v7 = vadd.f32 1.0, %v2145_v62 }
 0x162   :  { %v1024_v45 = vmul.f32 %v2141_v52, %v1023_v31  ;;  %2152 = vpow2.f32 %v1941_v5  ;;  %v1494_v9 = vsel %vm1493_vm5, %v2137_v37, %v1490_v1  ;;  %vm1042_vm7 = vweird.f32 %v2143_v56  ;;  %vm1028_vm9 = vmor %vm1026_vm15, %vm1027_vm6 }
 0x163   :  { %v1039_v11 = vmul.f32 %v2143_v56, %v1038_v35  ;;  %v1502_v6 = vmul.f32 %v2147_v63, %v3135_v32  ;;  %v2149_v12 = vpop.eup %2148  ;;  %v1499_v15 = vsel %vm3143_vm14, %v1498_v51, %v1494_v9  ;;  %vm3177_vm8 = vcmp.eq.f32.partialorder %v1510_v0, 8.507059e+37  ;;  %vm1043_vm10 = vmor %vm1041_vm0, %vm1042_vm7 }
 0x164   :  { %v1025_v2 = vadd.f32 %v2141_v52, %v1024_v45  ;;  %v1911_v4 = vmul.f32 -1.442695, %v319_v3  ;;  %1760 = vst [vmem:[#allocation2 + $0x188] sm:$0xff] %v1499_v15  ;;  %v1513_v18 = vor.u32 1.1754944e-38, %v1512_v50  ;;  %2154 = vrcp.f32 %v3172_v7 }
 0x165   :  { %v1040_v17 = vadd.f32 %v2143_v56, %v1039_v11  ;;  %v1503_v8 = vsub.f32 1.0, %v1502_v6  ;;  %vm1507_vm11 = vweird.f32 %v2147_v63  ;;  %vm1521_vm12 = vweird.f32 %v3154_v54 }
 0x166   :  { %v2151_v19 = vpop.eup %2150  ;;  %v1029_v21 = vsel %vm1028_vm9, %v2141_v52, %v1025_v2  ;;  %v3188_v24 = vadd.f32 1.0, %v2149_v12  ;;  %v1525_v10 = vand.u32 2147483647, %v3154_v54  ;;  %v1527_v14 = vand.u32 2147483648, %v3154_v54  ;;  %vm1508_vm13 = vmor %vm1506_vm4, %vm1507_vm11 }
 0x167   :  { %v1034_v23 = vsel %vm3157_vm1, %v1033_v30, %v1029_v21  ;;  %v1044_v55 = vsel %vm1043_vm10, %v2143_v56, %v1040_v17  ;;  %v1504_v25 = vmul.f32 %v2147_v63, %v1503_v8  ;;  %v1517_v22 = vmul.f32 %v2151_v19, %v3154_v54 }
 0x168   :  { %v2153_v34 = vpop.eup %2152  ;;  %1729 = vst [vmem:[#allocation2 + $0x90] sm:$0xff] %v1034_v23  ;;  %v1049_v27 = vsel %vm3162_vm3, %v1048_v33, %v1044_v55  ;;  %v1912_v20 = vmul.f32 -1.442695, %v432_v13  ;;  %v1060_v59 = vand.u32 2147483647, %v3172_v7  ;;  %2156 = vrcp.f32 %v3188_v24 }
 0x169   :  { %1730 = vst [vmem:[#allocation2 + $0x98] sm:$0xff] %v1049_v27  ;;  %v1505_v29 = vadd.f32 %v2147_v63, %v1504_v25  ;;  %v1518_v26 = vsub.f32 1.0, %v1517_v22  ;;  %vm1522_vm14 = vweird.f32 %v2151_v19  ;;  %v1062_v5 = vand.u32 2147483648, %v3172_v7 }
 0x16a   :  { %v3203_v37 = vadd.f32 1.0, %v2153_v34  ;;  %2158 = vpow2.f32 %v1942_v58  ;;  %v2155_v39 = vpop.eup %2154  ;;  %v1943_v46 = vmul.f32 -1.442695, %v367_v28  ;;  %vm3207_vm15 = vcmp.eq.f32.partialorder %v1525_v10, 8.507059e+37  ;;  %vm1523_vm2 = vmor %vm1521_vm12, %vm1522_vm14  ;;  %v322_v58 = vpop.f32.mrf.mxu0 }
 0x16b   :  { %v1509_v42 = vsel %vm1508_vm13, %v2147_v63, %v1505_v29  ;;  %v1519_v43 = vmul.f32 %v2151_v19, %v1518_v26  ;;  %2160 = vpow2.f32 %v1911_v4  ;;  %v1528_v32 = vor.u32 1.1754944e-38, %v1527_v14  ;;  %v435_v34 = vpop.f32.mrf.mxu1 }
 0x16c   :  { %v1514_v41 = vsel %vm3177_vm8, %v1513_v18, %v1509_v42  ;;  %v1052_v38 = vmul.f32 %v2155_v39, %v3172_v7  ;;  %vm1056_vm0 = vweird.f32 %v3172_v7  ;;  %vm3213_vm1 = vcmp.eq.f32.partialorder %v1060_v59, 8.507059e+37 }
 0x16d   :  { %1761 = vst [vmem:[#allocation2 + $0x190] sm:$0xff] %v1514_v41  ;;  %v1520_v47 = vadd.f32 %v2151_v19, %v1519_v43  ;;  %2162 = vrcp.f32 %v3203_v37  ;;  %v1063_v52 = vor.u32 1.1754944e-38, %v1062_v5  ;;  %v1075_v53 = vand.u32 2147483647, %v3188_v24 }
 0x16e   :  { %v1053_v36 = vsub.f32 1.0, %v1052_v38  ;;  %2164 = vpow2.f32 %v1912_v20  ;;  %v2157_v56 = vpop.eup %2156  ;;  %v1077_v44 = vand.u32 2147483648, %v3188_v24  ;;  %v1944_v30 = vmul.f32 -1.442695, %v480_v40  ;;  %v370_v40 = vpop.f32.mrf.mxu2 }
 0x16f   :  { %v1524_v57 = vsel %vm1523_vm2, %v2151_v19, %v1520_v47  ;;  %2166 = vpow2.f32 %v1943_v46  ;;  %vm1057_vm3 = vweird.f32 %v2155_v39  ;;  %v1067_v54 = vmul.f32 %v2157_v56, %v3188_v24 }
 0x170   :  { %v2159_v48 = vpop.eup %2158  ;;  %v1529_v60 = vsel %vm3207_vm15, %v1528_v32, %v1524_v57  ;;  %v1054_v61 = vmul.f32 %v2155_v39, %v1053_v36  ;;  %vm1071_vm4 = vweird.f32 %v3188_v24  ;;  %v1540_v31 = vand.u32 2147483647, %v3203_v37  ;;  %vm1058_vm5 = vmor %vm1056_vm0, %vm1057_vm3 }
 0x171   :  { %v2161_v62 = vpop.eup %2160  ;;  %1762 = vst [vmem:[#allocation2 + $0x198] sm:$0xff] %v1529_v60  ;;  %v3228_v33 = vadd.f32 1.0, %v2159_v48  ;;  %2168 = vpow2.f32 %v1944_v30  ;;  %v1068_v1 = vsub.f32 1.0, %v1067_v54  ;;  %v1913_v50 = vmul.f32 -1.442695, %v322_v58 }
 0x172   :  { %v1055_v0 = vadd.f32 %v2155_v39, %v1054_v61  ;;  %v3230_v35 = vadd.f32 1.0, %v2161_v62  ;;  %vm3234_vm6 = vcmp.eq.f32.partialorder %v1075_v53, 8.507059e+37  ;;  %v1078_v45 = vor.u32 1.1754944e-38, %v1077_v44 }
 0x173   :  { %v2163_v3 = vpop.eup %2162  ;;  %vm1536_vm7 = vweird.f32 %v3203_v37  ;;  %2170 = vrcp.f32 %v3228_v33  ;;  %v1069_v6 = vmul.f32 %v2157_v56, %v1068_v1  ;;  %vm1072_vm8 = vweird.f32 %v2157_v56 }
 0x174   :  { %v2165_v9 = vpop.eup %2164  ;;  %v1059_v11 = vsel %vm1058_vm5, %v2155_v39, %v1055_v0  ;;  %v1532_v12 = vmul.f32 %v2163_v3, %v3203_v37  ;;  %vm3243_vm9 = vcmp.eq.f32.partialorder %v1540_v31, 8.507059e+37  ;;  %v1542_v16 = vand.u32 2147483648, %v3203_v37  ;;  %vm1073_vm10 = vmor %vm1071_vm4, %vm1072_vm8 }
 0x175   :  { %v2167_v15 = vpop.eup %2166  ;;  %v1064_v7 = vsel %vm3213_vm1, %v1063_v52, %v1059_v11  ;;  %2172 = vrcp.f32 %v3230_v35  ;;  %v1070_v4 = vadd.f32 %v2157_v56, %v1069_v6  ;;  %v1555_v8 = vand.u32 2147483647, %v3228_v33  ;;  %v483_v52 = vpop.f32.mrf.mxu3 }
 0x176   :  { %1731 = vst [vmem:[#allocation2 + $0xa0] sm:$0xff] %v1064_v7  ;;  %v1533_v17 = vsub.f32 1.0, %v1532_v12  ;;  %2174 = vpow2.f32 %v1913_v50  ;;  %vm1537_vm11 = vweird.f32 %v2163_v3  ;;  %v1557_v13 = vand.u32 2147483648, %v3228_v33 }
 0x177   :  { %v2169_v18 = vpop.eup %2168  ;;  %v3253_v19 = vadd.f32 1.0, %v2165_v9  ;;  %v3255_v21 = vadd.f32 1.0, %v2167_v15  ;;  %v1074_v23 = vsel %vm1073_vm10, %v2157_v56, %v1070_v4  ;;  %v1090_v25 = vand.u32 2147483647, %v3230_v35  ;;  %vm1538_vm14 = vmor %vm1536_vm7, %vm1537_vm11  ;;  %v325_v15 = vpop.f32.mrf.mxu0 }
 0x178   :  { %v1534_v55 = vmul.f32 %v2163_v3, %v1533_v17  ;;  %v1092_v22 = vand.u32 2147483648, %v3230_v35  ;;  %v1079_v10 = vsel %vm3234_vm6, %v1078_v45, %v1074_v23  ;;  %v1543_v24 = vor.u32 1.1754944e-38, %v1542_v16  ;;  %v438_v17 = vpop.f32.mrf.mxu1 }
 0x179   :  { %v2171_v27 = vpop.eup %2170  ;;  %vm1551_vm12 = vweird.f32 %v3228_v33  ;;  %2176 = vrcp.f32 %v3253_v19  ;;  %1732 = vst [vmem:[#allocation2 + $0xa8] sm:$0xff] %v1079_v10  ;;  %vm3264_vm13 = vcmp.eq.f32.partialorder %v1555_v8, 8.507059e+37  ;;  %v3268_v29 = vadd.f32 1.0, %v2169_v18 }
 0x17a   :  { %v1535_v14 = vadd.f32 %v2163_v3, %v1534_v55  ;;  %v1547_v20 = vmul.f32 %v2171_v27, %v3228_v33  ;;  %v1558_v59 = vor.u32 1.1754944e-38, %v1557_v13  ;;  %vm1086_vm15 = vweird.f32 %v3230_v35 }
 0x17b   :  { %v2173_v26 = vpop.eup %2172  ;;  %2178 = vrcp.f32 %v3255_v21  ;;  %v1914_v5 = vmul.f32 -1.442695, %v435_v34  ;;  %vm3276_vm0 = vcmp.eq.f32.partialorder %v1090_v25, 8.507059e+37  ;;  %v1093_v49 = vor.u32 1.1754944e-38, %v1092_v22  ;;  %v373_v25 = vpop.f32.mrf.mxu2 }
 0x17c   :  { %v2175_v39 = vpop.eup %2174  ;;  %v1539_v42 = vsel %vm1538_vm14, %v2163_v3, %v1535_v14  ;;  %v1548_v43 = vsub.f32 1.0, %v1547_v20  ;;  %v1082_v46 = vmul.f32 %v2173_v26, %v3230_v35  ;;  %vm1552_vm1 = vweird.f32 %v2171_v27 }
 0x17d   :  { %v1544_v37 = vsel %vm3243_vm9, %v1543_v24, %v1539_v42  ;;  %v1105_v32 = vand.u32 2147483647, %v3253_v19  ;;  %v1107_v38 = vand.u32 2147483648, %v3253_v19  ;;  %v1570_v36 = vand.u32 2147483647, %v3255_v21  ;;  %vm1553_vm4 = vmor %vm1551_vm12, %vm1552_vm1  ;;  %v486_v10 = vpop.f32.mrf.mxu3 }
 0x17e   :  { %1763 = vst [vmem:[#allocation2 + $0x1a0] sm:$0xff] %v1544_v37  ;;  %v1549_v47 = vmul.f32 %v2171_v27, %v1548_v43  ;;  %v1083_v51 = vsub.f32 1.0, %v1082_v46  ;;  %2180 = vrcp.f32 %v3268_v29  ;;  %vm1087_vm2 = vweird.f32 %v2173_v26 }
 0x17f   :  { %v2177_v53 = vpop.eup %2176  ;;  %vm1101_vm3 = vweird.f32 %v3253_v19  ;;  %v1572_v56 = vand.u32 2147483648, %v3255_v21  ;;  %v3288_v57 = vadd.f32 1.0, %v2175_v39  ;;  %v1587_v48 = vand.u32 2147483648, %v3268_v29  ;;  %vm1088_vm8 = vmor %vm1086_vm15, %vm1087_vm2 }
 0x180   :  { %v1550_v44 = vadd.f32 %v2171_v27, %v1549_v47  ;;  %v1084_v30 = vmul.f32 %v2173_v26, %v1083_v51  ;;  %v1097_v58 = vmul.f32 %v2177_v53, %v3253_v19  ;;  %vm3295_vm5 = vcmp.eq.f32.partialorder %v1105_v32, 8.507059e+37  ;;  %v328_v32 = vpop.f32.mrf.mxu0 }
 0x181   :  { %v2179_v60 = vpop.eup %2178  ;;  %v1108_v54 = vor.u32 1.1754944e-38, %v1107_v38  ;;  %vm1566_vm6 = vweird.f32 %v3255_v21  ;;  %2182 = vrcp.f32 %v3288_v57  ;;  %vm3302_vm7 = vcmp.eq.f32.partialorder %v1570_v36, 8.507059e+37  ;;  %v441_v36 = vpop.f32.mrf.mxu1 }
 0x182   :  { %v1554_v62 = vsel %vm1553_vm4, %v2171_v27, %v1550_v44  ;;  %v1085_v31 = vadd.f32 %v2173_v26, %v1084_v30  ;;  %v1098_v0 = vsub.f32 1.0, %v1097_v58  ;;  %v1562_v1 = vmul.f32 %v2179_v60, %v3255_v21 }
 0x183   :  { %v1559_v33 = vsel %vm3264_vm13, %v1558_v59, %v1554_v62  ;;  %vm1102_vm9 = vweird.f32 %v2177_v53  ;;  %v1573_v3 = vor.u32 1.1754944e-38, %v1572_v56  ;;  %vm1581_vm10 = vweird.f32 %v3268_v29  ;;  %v376_v30 = vpop.f32.mrf.mxu2 }
 0x184   :  { %v1585_v63 = vand.u32 2147483647, %v3268_v29  ;;  %v2181_v45 = vpop.eup %2180  ;;  %1764 = vst [vmem:[#allocation2 + $0x1a8] sm:$0xff] %v1559_v33  ;;  %v1089_v9 = vsel %vm1088_vm8, %v2173_v26, %v1085_v31  ;;  %v1099_v11 = vmul.f32 %v2177_v53, %v1098_v0  ;;  %v1563_v6 = vsub.f32 1.0, %v1562_v1  ;;  %vm1103_vm13 = vmor %vm1101_vm3, %vm1102_vm9 }
 0x185   :  { %v1588_v12 = vor.u32 1.1754944e-38, %v1587_v48  ;;  %v1094_v7 = vsel %vm3276_vm0, %v1093_v49, %v1089_v9  ;;  %vm1567_vm11 = vweird.f32 %v2179_v60  ;;  %v1577_v35 = vmul.f32 %v2181_v45, %v3268_v29 }
 0x186   :  { %vm1116_vm12 = vweird.f32 %v3288_v57  ;;  %1733 = vst [vmem:[#allocation2 + $0xb0] sm:$0xff] %v1094_v7  ;;  %v1100_v2 = vadd.f32 %v2177_v53, %v1099_v11  ;;  %v1564_v16 = vmul.f32 %v2179_v60, %v1563_v6  ;;  %v1120_v4 = vand.u32 2147483647, %v3288_v57  ;;  %vm1568_vm15 = vmor %vm1566_vm6, %vm1567_vm11 }
 0x187   :  { %2184 = vpow2.f32 %v1914_v5  ;;  %v2183_v8 = vpop.eup %2182  ;;  %v1578_v18 = vsub.f32 1.0, %v1577_v35  ;;  %v1122_v13 = vand.u32 2147483648, %v3288_v57  ;;  %v1945_v23 = vmul.f32 -1.442695, %v370_v40 }
 0x188   :  { %v1946_v55 = vmul.f32 -1.442695, %v483_v52  ;;  %v1104_v22 = vsel %vm1103_vm13, %v2177_v53, %v1100_v2  ;;  %v1565_v34 = vadd.f32 %v2179_v60, %v1564_v16  ;;  %vm1582_vm14 = vweird.f32 %v2181_v45 }
 0x189   :  { %v1112_v27 = vmul.f32 %v2183_v8, %v3288_v57  ;;  %v1109_v24 = vsel %vm3295_vm5, %v1108_v54, %v1104_v22  ;;  %v1579_v19 = vmul.f32 %v2181_v45, %v1578_v18  ;;  %2186 = vpow2.f32 %v1945_v23  ;;  %vm1583_vm0 = vmor %vm1581_vm10, %vm1582_vm14 }
 0x18a   :  { %v1915_v14 = vmul.f32 -1.442695, %v325_v15  ;;  %1734 = vst [vmem:[#allocation2 + $0xb8] sm:$0xff] %v1109_v24  ;;  %v1569_v20 = vsel %vm1568_vm15, %v2179_v60, %v1565_v34  ;;  %2188 = vpow2.f32 %v1946_v55  ;;  %v1916_v26 = vmul.f32 -1.442695, %v438_v17  ;;  %v489_v60 = vpop.f32.mrf.mxu3 }
 0x18b   :  { %v1113_v28 = vsub.f32 1.0, %v1112_v27  ;;  %v1574_v59 = vsel %vm3302_vm7, %v1573_v3, %v1569_v20  ;;  %v1580_v5 = vadd.f32 %v2181_v45, %v1579_v19  ;;  %v1947_v39 = vmul.f32 -1.442695, %v373_v25 }
 0x18c   :  { %2190 = vpow2.f32 %v1915_v14  ;;  %1765 = vst [vmem:[#allocation2 + $0x1b0] sm:$0xff] %v1574_v59  ;;  %vm1117_vm1 = vweird.f32 %v2183_v8  ;;  %v1948_v43 = vmul.f32 -1.442695, %v486_v10  ;;  %vm1586_vm2 = vcmp.eq.f32.partialorder %v1585_v63, 8.507059e+37 }
 0x18d   :  { %v2185_v42 = vpop.eup %2184  ;;  %v1114_v21 = vmul.f32 %v2183_v8, %v1113_v28  ;;  %2192 = vpow2.f32 %v1916_v26  ;;  %v1584_v46 = vsel %vm1583_vm0, %v2181_v45, %v1580_v5  ;;  %vm1118_vm3 = vmor %vm1116_vm12, %vm1117_vm1  ;;  %v1123_v29 = vor.u32 1.1754944e-38, %v1122_v13 }
 0x18e   :  { %v3333_v41 = vadd.f32 1.0, %v2185_v42  ;;  %2194 = vpow2.f32 %v1947_v39  ;;  %v1589_v49 = vsel %vm1586_vm2, %v1588_v12, %v1584_v46  ;;  %vm1121_vm4 = vcmp.eq.f32.partialorder %v1120_v4, 8.507059e+37 }
 0x18f   :  { %v1115_v37 = vadd.f32 %v2183_v8, %v1114_v21  ;;  %2196 = vpow2.f32 %v1948_v43  ;;  %v2187_v38 = vpop.eup %2186  ;;  %1766 = vst [vmem:[#allocation2 + $0x1b8] sm:$0xff] %v1589_v49  ;;  %v1917_v44 = vmul.f32 -1.442695, %v328_v32  ;;  %v3348_v31 = vmul.f32 -1.442695, %v441_v36 }
 0x190   :  { %2198 = vrcp.f32 %v3333_v41  ;;  %v2189_v40 = vpop.eup %2188  ;;  %v3338_v51 = vadd.f32 1.0, %v2187_v38  ;;  %v1135_v57 = vand.u32 2147483647, %v3333_v41  ;;  %v1137_v48 = vand.u32 2147483648, %v3333_v41 }
 0x191   :  { %v1119_v47 = vsel %vm1118_vm3, %v2183_v8, %v1115_v37  ;;  %v3340_v56 = vadd.f32 1.0, %v2189_v40  ;;  %vm1131_vm5 = vweird.f32 %v3333_v41  ;;  %v3355_v33 = vmul.f32 -1.442695, %v376_v30 }
 0x192   :  { %v2191_v52 = vpop.eup %2190  ;;  %v1124_v53 = vsel %vm1121_vm4, %v1123_v29, %v1119_v47  ;;  %2200 = vrcp.f32 %v3338_v51  ;;  %v1602_v54 = vand.u32 2147483648, %v3338_v51  ;;  %v1600_v63 = vand.u32 2147483647, %v3338_v51 }
 0x193   :  { %v2193_v58 = vpop.eup %2192  ;;  %1735 = vst [vmem:[#allocation2 + $0xc0] sm:$0xff] %v1124_v53  ;;  %2202 = vrcp.f32 %v3340_v56  ;;  %v1617_v62 = vand.u32 2147483648, %v3340_v56  ;;  %v3351_v1 = vadd.f32 1.0, %v2191_v52  ;;  %v3360_v9 = vmul.f32 -1.442695, %v489_v60 }
 0x194   :  { %v2195_v61 = vpop.eup %2194  ;;  %v3353_v50 = vadd.f32 1.0, %v2193_v58  ;;  %2204 = vpow2.f32 %v1917_v44  ;;  %vm3363_vm6 = vcmp.eq.f32.partialorder %v1135_v57, 8.507059e+37  ;;  %v1138_v12 = vor.u32 1.1754944e-38, %v1137_v48 }
 0x195   :  { %v2197_v0 = vpop.eup %2196  ;;  %v3358_v45 = vadd.f32 1.0, %v2195_v61  ;;  %v1615_v15 = vand.u32 2147483647, %v3340_v56  ;;  %2206 = vrcp.f32 %v3351_v1  ;;  %vm1596_vm7 = vweird.f32 %v3338_v51 }
 0x196   :  { %v2199_v3 = vpop.eup %2198  ;;  %v1603_v7 = vor.u32 1.1754944e-38, %v1602_v54  ;;  %v3370_v35 = vor.u32 1.1754944e-38, %v1617_v62  ;;  %v1152_v2 = vand.u32 2147483648, %v3351_v1  ;;  %2208 = vrcp.f32 %v3353_v50 }
 0x197   :  { %v1127_v11 = vmul.f32 %v2199_v3, %v3333_v41  ;;  %vm1132_vm8 = vweird.f32 %v2199_v3  ;;  %vm1611_vm9 = vweird.f32 %v3340_v56  ;;  %2210 = vrcp.f32 %v3358_v45 }
 0x198   :  { %v2201_v16 = vpop.eup %2200  ;;  %v3376_v17 = vadd.f32 1.0, %v2197_v0  ;;  %vm3379_vm10 = vcmp.eq.f32.partialorder %v1600_v63, 8.507059e+37  ;;  %vm1146_vm11 = vweird.f32 %v3351_v1  ;;  %v1150_v23 = vand.u32 2147483647, %v3351_v1  ;;  %vm1133_vm0 = vmor %vm1131_vm5, %vm1132_vm8 }
 0x199   :  { %v1128_v4 = vsub.f32 1.0, %v1127_v11  ;;  %v2203_v8 = vpop.eup %2202  ;;  %v1592_v18 = vmul.f32 %v2201_v16, %v3338_v51  ;;  %v1167_v55 = vand.u32 2147483648, %v3353_v50  ;;  %vm3387_vm12 = vcmp.eq.f32.partialorder %v1615_v15, 8.507059e+37 }
 0x19a   :  { %v1607_v22 = vmul.f32 %v2203_v8, %v3340_v56  ;;  %vm1161_vm13 = vweird.f32 %v3353_v50  ;;  %v1165_v27 = vand.u32 2147483647, %v3353_v50  ;;  %v2205_v10 = vpop.eup %2204  ;;  %vm1597_vm14 = vweird.f32 %v2201_v16 }
 0x19b   :  { %v1129_v25 = vmul.f32 %v2199_v3, %v1128_v4  ;;  %v1593_v24 = vsub.f32 1.0, %v1592_v18  ;;  %vm1612_vm15 = vweird.f32 %v2203_v8  ;;  %v1153_v19 = vor.u32 1.1754944e-38, %v1152_v2  ;;  %v2207_v14 = vpop.eup %2206  ;;  %vm1598_vm4 = vmor %vm1596_vm7, %vm1597_vm14  ;;  %v331_v2 = vpop.f32.mrf.mxu0 }
 0x19c   :  { %v1608_v28 = vsub.f32 1.0, %v1607_v22  ;;  %v1630_v26 = vand.u32 2147483647, %v3358_v45  ;;  %2212 = vrcp.f32 %v3376_v17  ;;  %v2209_v59 = vpop.eup %2208  ;;  %v1142_v39 = vmul.f32 %v2207_v14, %v3351_v1  ;;  %v379_v18 = vpop.f32.mrf.mxu2 }
 0x19d   :  { %v1130_v20 = vadd.f32 %v2199_v3, %v1129_v25  ;;  %v1594_v5 = vmul.f32 %v2201_v16, %v1593_v24  ;;  %vm3399_vm1 = vcmp.eq.f32.partialorder %v1150_v23, 8.507059e+37  ;;  %v1168_v21 = vor.u32 1.1754944e-38, %v1167_v55  ;;  %v2211_v43 = vpop.eup %2210  ;;  %v492_v24 = vpop.f32.mrf.mxu3 }
 0x19e   :  { %vm1626_vm2 = vweird.f32 %v3358_v45  ;;  %v1609_v49 = vmul.f32 %v2203_v8, %v1608_v28  ;;  %v1157_v37 = vmul.f32 %v2209_v59, %v3353_v50  ;;  %vm3405_vm3 = vcmp.eq.f32.partialorder %v1165_v27, 8.507059e+37 }
 0x19f   :  { %v1134_v46 = vsel %vm1133_vm0, %v2199_v3, %v1130_v20  ;;  %v1632_v41 = vand.u32 2147483648, %v3358_v45  ;;  %v1595_v29 = vadd.f32 %v2201_v16, %v1594_v5  ;;  %v1143_v40 = vsub.f32 1.0, %v1142_v39 }
 0x1a0   :  { %v1139_v38 = vsel %vm3363_vm6, %v1138_v12, %v1134_v46  ;;  %v1622_v47 = vmul.f32 %v2211_v43, %v3358_v45  ;;  %v1610_v36 = vadd.f32 %v2203_v8, %v1609_v49  ;;  %vm1147_vm5 = vweird.f32 %v2207_v14  ;;  %vm1613_vm6 = vmor %vm1611_vm9, %vm1612_vm15 }
 0x1a1   :  { %1736 = vst [vmem:[#allocation2 + $0xc8] sm:$0xff] %v1139_v38  ;;  %v1158_v52 = vsub.f32 1.0, %v1157_v37  ;;  %vm3416_vm8 = vcmp.eq.f32.partialorder %v1630_v26, 8.507059e+37  ;;  %v1599_v44 = vsel %vm1598_vm4, %v2201_v16, %v1595_v29  ;;  %v1144_v30 = vmul.f32 %v2207_v14, %v1143_v40  ;;  %vm1148_vm9 = vmor %vm1146_vm11, %vm1147_vm5  ;;  %v444_v16 = vpop.f32.mrf.mxu1 }
 0x1a2   :  { %vm1162_vm0 = vweird.f32 %v2209_v59  ;;  %v1623_v58 = vsub.f32 1.0, %v1622_v47  ;;  %v2213_v57 = vpop.eup %2212  ;;  %v1604_v51 = vsel %vm3379_vm10, %v1603_v7, %v1599_v44  ;;  %v1614_v48 = vsel %vm1613_vm6, %v2203_v8, %v1610_v36 }
 0x1a3   :  { %v1159_v60 = vmul.f32 %v2209_v59, %v1158_v52  ;;  %vm1627_vm7 = vweird.f32 %v2211_v43  ;;  %1767 = vst [vmem:[#allocation2 + $0x1c0] sm:$0xff] %v1604_v51  ;;  %v1619_v61 = vsel %vm3387_vm12, %v3370_v35, %v1614_v48  ;;  %v1145_v54 = vadd.f32 %v2207_v14, %v1144_v30  ;;  %vm1163_vm14 = vmor %vm1161_vm13, %vm1162_vm0 }
 0x1a4   :  { %v1624_v62 = vmul.f32 %v2211_v43, %v1623_v58  ;;  %v1637_v56 = vmul.f32 %v2213_v57, %v3376_v17  ;;  %1768 = vst [vmem:[#allocation2 + $0x1c8] sm:$0xff] %v1619_v61  ;;  %v1633_v3 = vor.u32 1.1754944e-38, %v1632_v41  ;;  %vm1642_vm10 = vweird.f32 %v2213_v57  ;;  %vm1628_vm11 = vmor %vm1626_vm2, %vm1627_vm7 }
 0x1a5   :  { %v1160_v0 = vadd.f32 %v2209_v59, %v1159_v60  ;;  %v1645_v63 = vand.u32 2147483647, %v3376_v17  ;;  %v1149_v11 = vsel %vm1148_vm9, %v2207_v14, %v1145_v54  ;;  %v715_v15 = vadd.f32 1.0, %v2205_v10 }
 0x1a6   :  { %v1625_v6 = vadd.f32 %v2211_v43, %v1624_v62  ;;  %v1638_v12 = vsub.f32 1.0, %v1637_v56  ;;  %v1154_v7 = vsel %vm3399_vm1, %v1153_v19, %v1149_v11  ;;  %v1647_v1 = vand.u32 2147483648, %v3376_v17 }
 0x1a7   :  { %v1164_v35 = vsel %vm1163_vm14, %v2209_v59, %v1160_v0  ;;  %2214 = vpow2.f32 %v3348_v31  ;;  %1737 = vst [vmem:[#allocation2 + $0xd0] sm:$0xff] %v1154_v7  ;;  %vm1641_vm12 = vweird.f32 %v3376_v17  ;;  %v1919_v31 = vmul.f32 -1.442695, %v331_v2 }
 0x1a8   :  { %v1169_v50 = vsel %vm3405_vm3, %v1168_v21, %v1164_v35  ;;  %v1629_v4 = vsel %vm1628_vm11, %v2211_v43, %v1625_v6  ;;  %v1639_v8 = vmul.f32 %v2213_v57, %v1638_v12  ;;  %2216 = vrcp.f32 %v715_v15  ;;  %vm1643_vm13 = vmor %vm1641_vm12, %vm1642_vm10 }
 0x1a9   :  { %1738 = vst [vmem:[#allocation2 + $0xd8] sm:$0xff] %v1169_v50  ;;  %v1634_v13 = vsel %vm3416_vm8, %v1633_v3, %v1629_v4  ;;  %2218 = vpow2.f32 %v3355_v33  ;;  %v1920_v23 = vmul.f32 -1.442695, %v444_v16  ;;  %v1648_v55 = vor.u32 1.1754944e-38, %v1647_v1 }
 0x1aa   :  { %1769 = vst [vmem:[#allocation2 + $0x1d0] sm:$0xff] %v1634_v13  ;;  %v1640_v45 = vadd.f32 %v2213_v57, %v1639_v8  ;;  %2220 = vpow2.f32 %v3360_v9  ;;  %v1951_v25 = vmul.f32 -1.442695, %v379_v18  ;;  %vm1646_vm15 = vcmp.eq.f32.partialorder %v1645_v63, 8.507059e+37 }
 0x1ab   :  { %2222 = vpow2.f32 %v1919_v31  ;;  %v1180_v14 = vand.u32 2147483647, %v715_v15  ;;  %v1952_v26 = vmul.f32 -1.442695, %v492_v24  ;;  %v1182_v5 = vand.u32 2147483648, %v715_v15 }
 0x1ac   :  { %v1644_v22 = vsel %vm1643_vm13, %v2213_v57, %v1640_v45  ;;  %2224 = vpow2.f32 %v1920_v23  ;;  %vm1176_vm1 = vweird.f32 %v715_v15 }
 0x1ad   :  { %v2215_v34 = vpop.eup %2214  ;;  %v1649_v27 = vsel %vm1646_vm15, %v1648_v55, %v1644_v22  ;;  %2226 = vpow2.f32 %v1951_v25  ;;  %vm3459_vm3 = vcmp.eq.f32.partialorder %v1180_v14, 8.507059e+37  ;;  %v1183_v38 = vor.u32 1.1754944e-38, %v1182_v5 }
 0x1ae   :  { %v2217_v10 = vpop.eup %2216  ;;  %1770 = vst [vmem:[#allocation2 + $0x1d8] sm:$0xff] %v1649_v27  ;;  %v3451_v17 = vadd.f32 1.0, %v2215_v34 }
 0x1af   :  { %v1172_v33 = vmul.f32 %v2217_v10, %v715_v15  ;;  %v2219_v19 = vpop.eup %2218  ;;  %vm1177_vm2 = vweird.f32 %v2217_v10 }
 0x1b0   :  { %2228 = vrcp.f32 %v3451_v17  ;;  %v2221_v20 = vpop.eup %2220  ;;  %v3454_v28 = vadd.f32 1.0, %v2219_v19  ;;  %v1195_v37 = vand.u32 2147483647, %v3451_v17  ;;  %vm1178_vm4 = vmor %vm1176_vm1, %vm1177_vm2  ;;  %vm1191_vm5 = vweird.f32 %v3451_v17 }
 0x1b1   :  { %v1173_v9 = vsub.f32 1.0, %v1172_v33  ;;  %v2223_v59 = vpop.eup %2222  ;;  %v3456_v39 = vadd.f32 1.0, %v2221_v20  ;;  %v1197_v29 = vand.u32 2147483648, %v3451_v17 }
 0x1b2   :  { %v2225_v42 = vpop.eup %2224  ;;  %2230 = vrcp.f32 %v3454_v28  ;;  %v3465_v32 = vadd.f32 1.0, %v2223_v59  ;;  %v1660_v52 = vand.u32 2147483647, %v3454_v28  ;;  %v1662_v53 = vand.u32 2147483648, %v3454_v28 }
 0x1b3   :  { %v1174_v21 = vmul.f32 %v2217_v10, %v1173_v9  ;;  %2232 = vrcp.f32 %v3456_v39  ;;  %v2227_v46 = vpop.eup %2226  ;;  %v3469_v40 = vadd.f32 1.0, %v2225_v42  ;;  %v1675_v30 = vand.u32 2147483647, %v3456_v39 }
 0x1b4   :  { %2234 = vpow2.f32 %v1952_v26  ;;  %v3478_v58 = vadd.f32 1.0, %v2227_v46  ;;  %vm3480_vm8 = vcmp.eq.f32.partialorder %v1195_v37, 8.507059e+37  ;;  %v1677_v60 = vand.u32 2147483648, %v3456_v39 }
 0x1b5   :  { %v1175_v49 = vadd.f32 %v2217_v10, %v1174_v21  ;;  %2236 = vrcp.f32 %v3465_v32  ;;  %v1198_v54 = vor.u32 1.1754944e-38, %v1197_v29  ;;  %vm1656_vm6 = vweird.f32 %v3454_v28 }
 0x1b6   :  { %v2229_v41 = vpop.eup %2228  ;;  %2238 = vrcp.f32 %v3469_v40  ;;  %vm1671_vm0 = vweird.f32 %v3456_v39  ;;  %vm3489_vm9 = vcmp.eq.f32.partialorder %v1660_v52, 8.507059e+37  ;;  %v1663_v6 = vor.u32 1.1754944e-38, %v1662_v53 }
 0x1b7   :  { %v1179_v47 = vsel %vm1178_vm4, %v2217_v10, %v1175_v49  ;;  %v1187_v36 = vmul.f32 %v2229_v41, %v3451_v17  ;;  %vm1192_vm7 = vweird.f32 %v2229_v41  ;;  %vm3494_vm10 = vcmp.eq.f32.partialorder %v1675_v30, 8.507059e+37 }
 0x1b8   :  { %v1184_v44 = vsel %vm3459_vm3, %v1183_v38, %v1179_v47  ;;  %v2231_v57 = vpop.eup %2230  ;;  %2240 = vrcp.f32 %v3478_v58  ;;  %v1678_v35 = vor.u32 1.1754944e-38, %v1677_v60  ;;  %vm1206_vm14 = vweird.f32 %v3465_v32  ;;  %vm1193_vm11 = vmor %vm1191_vm5, %vm1192_vm7 }
 0x1b9   :  { %1739 = vst [vmem:[#allocation2 + $0xe0] sm:$0xff] %v1184_v44  ;;  %v1188_v51 = vsub.f32 1.0, %v1187_v36  ;;  %v2233_v61 = vpop.eup %2232  ;;  %v1652_v62 = vmul.f32 %v2231_v57, %v3454_v28  ;;  %vm1657_vm12 = vweird.f32 %v2231_v57  ;;  %v1210_v16 = vand.u32 2147483647, %v3465_v32 }
 0x1ba   :  { %v2235_v56 = vpop.eup %2234  ;;  %v1667_v63 = vmul.f32 %v2233_v61, %v3456_v39  ;;  %vm1672_vm13 = vweird.f32 %v2233_v61  ;;  %v1212_v23 = vand.u32 2147483648, %v3465_v32  ;;  %vm1658_vm15 = vmor %vm1656_vm6, %vm1657_vm12  ;;  %vm1221_vm1 = vweird.f32 %v3469_v40 }
 0x1bb   :  { %v1189_v0 = vmul.f32 %v2229_v41, %v1188_v51  ;;  %v1653_v11 = vsub.f32 1.0, %v1652_v62  ;;  %v2237_v1 = vpop.eup %2236  ;;  %v3503_v50 = vadd.f32 1.0, %v2235_v56  ;;  %v1227_v34 = vand.u32 2147483648, %v3469_v40  ;;  %vm1673_vm2 = vmor %vm1671_vm0, %vm1672_vm13 }
 0x1bc   :  { %v1668_v7 = vsub.f32 1.0, %v1667_v63  ;;  %v2239_v4 = vpop.eup %2238  ;;  %v1202_v13 = vmul.f32 %v2237_v1, %v3465_v32  ;;  %vm1207_vm3 = vweird.f32 %v2237_v1  ;;  %v1225_v28 = vand.u32 2147483647, %v3469_v40 }
 0x1bd   :  { %v1190_v15 = vadd.f32 %v2229_v41, %v1189_v0  ;;  %v1654_v2 = vmul.f32 %v2231_v57, %v1653_v11  ;;  %v1217_v55 = vmul.f32 %v2239_v4, %v3469_v40  ;;  %2242 = vrcp.f32 %v3503_v50 }
 0x1be   :  { %v1669_v18 = vmul.f32 %v2233_v61, %v1668_v7  ;;  %v1203_v22 = vsub.f32 1.0, %v1202_v13  ;;  %v2241_v27 = vpop.eup %2240  ;;  %vm1222_vm4 = vweird.f32 %v2239_v4  ;;  %vm1211_vm5 = vcmp.eq.f32.partialorder %v1210_v16, 8.507059e+37 }
 0x1bf   :  { %v1194_v8 = vsel %vm1193_vm11, %v2229_v41, %v1190_v15  ;;  %v1655_v31 = vadd.f32 %v2231_v57, %v1654_v2  ;;  %v1218_v17 = vsub.f32 1.0, %v1217_v55  ;;  %v1682_v14 = vmul.f32 %v2241_v27, %v3478_v58  ;;  %vm1223_vm6 = vmor %vm1221_vm1, %vm1222_vm4 }
 0x1c0   :  { %v1199_v45 = vsel %vm3480_vm8, %v1198_v54, %v1194_v8  ;;  %v1670_v25 = vadd.f32 %v2233_v61, %v1669_v18  ;;  %v1204_v19 = vmul.f32 %v2237_v1, %v1203_v22  ;;  %vm1208_vm8 = vmor %vm1206_vm14, %vm1207_vm3  ;;  %v1213_v5 = vor.u32 1.1754944e-38, %v1212_v23 }
 0x1c1   :  { %1740 = vst [vmem:[#allocation2 + $0xe8] sm:$0xff] %v1199_v45  ;;  %v1659_v10 = vsel %vm1658_vm15, %v2231_v57, %v1655_v31  ;;  %v1219_v9 = vmul.f32 %v2239_v4, %v1218_v17  ;;  %v1683_v59 = vsub.f32 1.0, %v1682_v14  ;;  %v1690_v42 = vand.u32 2147483647, %v3478_v58 }
 0x1c2   :  { %v1664_v24 = vsel %vm3489_vm9, %v1663_v6, %v1659_v10  ;;  %v1674_v33 = vsel %vm1673_vm2, %v2233_v61, %v1670_v25  ;;  %v1205_v26 = vadd.f32 %v2237_v1, %v1204_v19  ;;  %v1692_v21 = vand.u32 2147483648, %v3478_v58 }
 0x1c3   :  { %1771 = vst [vmem:[#allocation2 + $0x1e0] sm:$0xff] %v1664_v24  ;;  %v1679_v20 = vsel %vm3494_vm10, %v1678_v35, %v1674_v33  ;;  %v1220_v39 = vadd.f32 %v2239_v4, %v1219_v9  ;;  %v1228_v46 = vor.u32 1.1754944e-38, %v1227_v34  ;;  %v1684_v49 = vmul.f32 %v2241_v27, %v1683_v59  ;;  %v2243_v37 = vpop.eup %2242 }
 0x1c4   :  { %1772 = vst [vmem:[#allocation2 + $0x1e8] sm:$0xff] %v1679_v20  ;;  %v1209_v43 = vsel %vm1208_vm8, %v2237_v1, %v1205_v26  ;;  %vm1687_vm0 = vweird.f32 %v2241_v27  ;;  %vm1226_vm7 = vcmp.eq.f32.partialorder %v1225_v28, 8.507059e+37  ;;  %vm1686_vm9 = vweird.f32 %v3478_v58 }
 0x1c5   :  { %v1214_v41 = vsel %vm1211_vm5, %v1213_v5, %v1209_v43  ;;  %v1224_v38 = vsel %vm1223_vm6, %v2239_v4, %v1220_v39  ;;  %v1685_v29 = vadd.f32 %v2241_v27, %v1684_v49  ;;  %v1697_v47 = vmul.f32 %v2243_v37, %v3503_v50  ;;  %vm1688_vm10 = vmor %vm1686_vm9, %vm1687_vm0 }
 0x1c6   :  { %1741 = vst [vmem:[#allocation2 + $0xf0] sm:$0xff] %v1214_v41  ;;  %v1229_v32 = vsel %vm1226_vm7, %v1228_v46, %v1224_v38  ;;  %v1693_v36 = vor.u32 1.1754944e-38, %v1692_v21  ;;  %vm1691_vm14 = vcmp.eq.f32.partialorder %v1690_v42, 8.507059e+37  ;;  %v1707_v44 = vand.u32 2147483648, %v3503_v50 }
 0x1c7   :  { %1742 = vst [vmem:[#allocation2 + $0xf8] sm:$0xff] %v1229_v32  ;;  %v1689_v52 = vsel %vm1688_vm10, %v2241_v27, %v1685_v29  ;;  %v1698_v40 = vsub.f32 1.0, %v1697_v47  ;;  %vm1702_vm11 = vweird.f32 %v2243_v37  ;;  %v1705_v57 = vand.u32 2147483647, %v3503_v50 }
 0x1c8   :  { %v1694_v53 = vsel %vm1691_vm14, %v1693_v36, %v1689_v52  ;;  %vm1701_vm12 = vweird.f32 %v3503_v50  ;;  %v1708_v51 = vor.u32 1.1754944e-38, %v1707_v44 }
 0x1c9   :  { %1773 = vst [vmem:[#allocation2 + $0x1f0] sm:$0xff] %v1694_v53  ;;  %v1699_v30 = vmul.f32 %v2243_v37, %v1698_v40  ;;  %vm1703_vm13 = vmor %vm1701_vm12, %vm1702_vm11  ;;  %vm1706_vm15 = vcmp.eq.f32.partialorder %v1705_v57, 8.507059e+37 }
 0x1cb   :  { %v1700_v58 = vadd.f32 %v2243_v37, %v1699_v30 }
 0x1cd   :  { %v1704_v48 = vsel %vm1703_vm13, %v2243_v37, %v1700_v58 }
 0x1ce   :  { %v1709_v60 = vsel %vm1706_vm15, %v1708_v51, %v1704_v48 }
 0x1cf   :  { %1774 = vst [vmem:[#allocation2 + $0x1f8] sm:$0xff] %v1709_v60 }
 0x1d0   :  { %1787 = dma.vmem_to_hbm [thread:$0]  %s1780_s22, 8192, %s1782_s25, [#allocation3], %s2271_s26, %s2271_s26, %s2272_s27  }
 0x1d1   :  { %2268 = dma.done.wait [#allocation3], 8192  }
 0x1d2   :  { %2269 = vsyncadd [#allocation3], 4294959104 }
 0x1d3   :  { %1792 = vsyncpa [#allocation3], 1 }

</bundles_post_ra>
